<compile_context>
chip_gen: v7x
topology: tpu7x:2x2x1
jax: 0.10.0
libtpu: 0.0.40
codegen_flags: <defaults>
</compile_context>

<pallas_src>
import jax
import jax.numpy as jnp
from jax import lax
from jax.experimental import pallas as pl
from jax.experimental.pallas import tpu as pltpu


def _position_attention_kernel(x_full_ref, x_q_ref, wb_ref, wcd_ref, gamma_ref, o_ref):
    # x_full_ref: (C, N)   f32  -- all key positions for this batch element
    # x_q_ref:    (C, TQ)  f32  -- this query tile (also the residual)
    # wb_ref:     (C, C)   bf16
    # wcd_ref:    (2C, C)  bf16 -- [Wc; Wd]
    # gamma_ref:  (1, 1)   f32 in SMEM
    # o_ref:      (C, TQ)
    c = x_full_ref.shape[0]
    n_keys = x_full_ref.shape[1]

    x_full_bf = x_full_ref[...].astype(jnp.bfloat16)          # (C, N)
    x_q = x_q_ref[...]                                        # (C, TQ) f32 (residual)
    x_q_bf = x_q.astype(jnp.bfloat16)

    # Fused C/D 1x1-conv projections over ALL key positions: (2C, C) @ (C, N).
    cd = jnp.dot(wcd_ref[...], x_full_bf, preferred_element_type=jnp.float32)  # (2C, N)
    c_proj = cd[:c, :]                                        # (C, N)
    d_proj = cd[c:, :]                                        # (C, N)

    # B projection only for this query tile: (C, C) @ (C, TQ).
    b_q = jnp.dot(wb_ref[...], x_q_bf, preferred_element_type=jnp.float32)     # (C, TQ)

    # S[q, j] = sum_c B[c, q] * C[c, j]  (contract channel axes directly).
    s = lax.dot_general(
        b_q.astype(jnp.bfloat16), c_proj.astype(jnp.bfloat16),
        dimension_numbers=(((0,), (0,)), ((), ())),
        preferred_element_type=jnp.float32)                   # (TQ, N)

    # Softmax over keys (PyTorch dim=2); statistics in f32.
    s_max = jnp.max(s, axis=-1, keepdims=True)                # (TQ, 1)
    e = jnp.exp(s - s_max)                                    # (TQ, N) f32
    e_bf = e.astype(jnp.bfloat16)

    # Unnormalized attention: attn_u[ch, q] = sum_j D[ch, j] * E[q, j].
    attn_u = lax.dot_general(
        d_proj.astype(jnp.bfloat16), e_bf,
        dimension_numbers=(((1,), (1,)), ((), ())),
        preferred_element_type=jnp.float32)                   # (C, TQ)

    # Row-sums of E produced lane-aligned as (1, TQ) via a ones-row matmul, so
    # normalization is a sublane-broadcast multiply (no (TQ,1)->(1,TQ) relayout
    # and no TQxN divides).
    ones_row = jnp.ones((1, n_keys), dtype=jnp.bfloat16)
    denom = lax.dot_general(
        ones_row, e_bf,
        dimension_numbers=(((1,), (1,)), ((), ())),
        preferred_element_type=jnp.float32)                   # (1, TQ)
    attn = attn_u * pl.reciprocal(denom, approx=True)         # (C, TQ) f32

    gamma = gamma_ref[0, 0]
    o_ref[...] = (gamma * attn + x_q).astype(o_ref.dtype)


def _pick_query_tile(n):
    # Prefer large lane-aligned query tiles (amortize per-grid-step overhead);
    # fall back to one full tile when n is not 128-aligned.
    for cand in (512, 256, 128):
        if n % cand == 0:
            return cand
    return n


def position_attention(x_nchw, wb, wc, wd, gamma, *, tq=None):
    """Pallas implementation of PositionAttention.forward.

    x_nchw: (b, c, h, w) float32
    wb/wc/wd: (c, c) 1x1-conv weights, weight[out_ch, in_ch]
    gamma: (1,) scalar parameter
    """
    b, c, h, w = x_nchw.shape
    n = h * w

    # Channel-major (C, N) is exactly the NCHW layout -> free reshape, no transpose.
    x_cm = x_nchw.reshape(b, c, n)

    if tq is None:
        tq = _pick_query_tile(n)
    num_q = n // tq

    wb_bf = wb.astype(jnp.bfloat16)                                   # (C, C)
    wcd_bf = jnp.concatenate([wc, wd], axis=0).astype(jnp.bfloat16)   # (2C, C)
    gamma2d = jnp.reshape(gamma, (1, 1)).astype(jnp.float32)

    # Advisory cost estimate so XLA schedules neighbours around the custom call.
    flops = b * (num_q * 2 * (2 * c) * c * n   # fused C/D projection (recomputed per tile)
                 + 2 * c * c * n               # B projection (all query tiles combined)
                 + 4 * n * n * c               # scores + attention matmuls
                 + 2 * n * n)                  # denominator row
    transcendentals = b * (n * n + n)
    bytes_accessed = 3 * b * c * n * 4 + (wb_bf.size + wcd_bf.size) * 2 + 8
    cost = pl.CostEstimate(flops=flops, transcendentals=transcendentals,
                           bytes_accessed=bytes_accessed)

    out_cm = pl.pallas_call(
        _position_attention_kernel,
        out_shape=jax.ShapeDtypeStruct((b, c, n), x_nchw.dtype),
        grid_spec=pltpu.PrefetchScalarGridSpec(
            num_scalar_prefetch=0,
            grid=(b, num_q),
            in_specs=[
                # x, all key positions (block index constant along iq -> stays resident)
                pl.BlockSpec((None, c, n), lambda ib, iq: (ib, 0, 0)),
                # x, current query tile (also the residual)
                pl.BlockSpec((None, c, tq), lambda ib, iq: (ib, 0, iq)),
                pl.BlockSpec((c, c), lambda ib, iq: (0, 0)),          # Wb (bf16)
                pl.BlockSpec((2 * c, c), lambda ib, iq: (0, 0)),      # [Wc; Wd] (bf16)
                pl.BlockSpec(memory_space=pltpu.MemorySpace.SMEM),    # gamma scalar
            ],
            # Lane-dense output block: last dim is TQ (multiple of 128 or full N).
            out_specs=pl.BlockSpec((None, c, tq), lambda ib, iq: (ib, 0, iq)),
        ),
        compiler_params=pltpu.CompilerParams(
            # Stateless per-(batch, query-tile) work -> both axes can shard on v7x megacore.
            dimension_semantics=("parallel", "parallel"),
            # Safe on all generations (v5e/v6e 128 MiB, v7x 64 MiB physical); sized
            # for query tiles up to ~512 at DANet-scale N.
            vmem_limit_bytes=32 * 1024 * 1024,
        ),
        cost_estimate=cost,
    )(x_cm, x_cm, wb_bf, wcd_bf, gamma2d)

    return out_cm.reshape(b, c, h, w)


def position_attention_ref(x, wb, wc, wd, gamma):
    """Pure-JAX f32 reference mirroring the PyTorch forward exactly."""
    b, c, h, w = x.shape
    n = h * w
    xf = x.reshape(b, c, n)
    B = jnp.einsum("oi,bin->bon", wb, xf)
    C = jnp.einsum("oi,bin->bon", wc, xf)
    D = jnp.einsum("oi,bin->bon", wd, xf)
    S = jax.nn.softmax(jnp.einsum("bci,bcj->bij", B, C), axis=2)
    attn = jnp.einsum("bcj,bij->bci", D, S).reshape(b, c, h, w)
    return gamma[0] * attn + x


if __name__ == "__main__":
    key = jax.random.PRNGKey(0)
    kx, kb, kc, kd = jax.random.split(key, 4)

    batch, channels, height, width = 2, 32, 16, 16
    x = jax.random.normal(kx, (batch, channels, height, width), dtype=jnp.float32)

    # Deterministic parameter init (Conv2d 1x1 weights collapse to (C_out, C_in)).
    wb = jax.random.normal(kb, (channels, channels), dtype=jnp.float32) * 0.1
    wc = jax.random.normal(kc, (channels, channels), dtype=jnp.float32) * 0.1
    wd = jax.random.normal(kd, (channels, channels), dtype=jnp.float32) * 0.1

    # gamma is initialized to 0.0 in the module's __init__ -> output == x exactly
    # (residual path stays in f32), so the tight tolerance still holds with bf16 MXU.
    gamma0 = jnp.zeros((1,), dtype=jnp.float32)
    out0 = jax.block_until_ready(position_attention(x, wb, wc, wd, gamma0))
    ref0 = position_attention_ref(x, wb, wc, wd, gamma0)
    assert out0.shape == x.shape
    assert jnp.max(jnp.abs(out0 - ref0)) < 1e-4, "mismatch at gamma=0"

    # Non-trivial gamma exercises the attention path; bf16 MXU operands with f32
    # accumulation/softmax stats -> relaxed tolerance vs the f32 reference.
    gamma1 = jnp.full((1,), 0.5, dtype=jnp.float32)
    out1 = jax.block_until_ready(position_attention(x, wb, wc, wd, gamma1))
    ref1 = position_attention_ref(x, wb, wc, wd, gamma1)
    assert jnp.max(jnp.abs(out1 - ref1)) < 5e-2, "mismatch at gamma=0.5"

    # Multi-tile query grid (n=1024 -> TQ=512, 2 query tiles) to exercise tiling.
    x2 = jax.random.normal(jax.random.PRNGKey(1), (1, channels, 32, 32), dtype=jnp.float32)
    gamma2 = jnp.full((1,), 0.7, dtype=jnp.float32)
    out2 = jax.block_until_ready(position_attention(x2, wb, wc, wd, gamma2))
    ref2 = position_attention_ref(x2, wb, wc, wd, gamma2)
    assert jnp.max(jnp.abs(out2 - ref2)) < 5e-2, "mismatch on tiled query grid"

    print("KERNEL_OK")
</pallas_src>

<mosaic_0001>
module attributes {stable_mosaic.version = 11 : i64} {
  func.func @_position_attention_kernel(%arg0: i32, %arg1: i32, %arg2: memref<1x32x256xf32, #tpu.memory_space<vmem>>, %arg3: memref<1x32x256xf32, #tpu.memory_space<vmem>>, %arg4: memref<32x32xbf16, #tpu.memory_space<vmem>>, %arg5: memref<64x32xbf16, #tpu.memory_space<vmem>>, %arg6: memref<1x1xf32, #tpu.memory_space<smem>>, %arg7: memref<1x32x256xf32, #tpu.memory_space<vmem>>) attributes {dimension_semantics = [#tpu.dimension_semantics<parallel>, #tpu.dimension_semantics<parallel>], iteration_bounds = array<i64: 2, 1>, scalar_prefetch = 0 : i64, scratch_operands = 0 : i64, tpu.core_type = #tpu.core_type<tc>, window_params = [{transform_indices = @transform_0, window_bounds = array<i64: 1, 32, 256>}, {transform_indices = @transform_1, window_bounds = array<i64: 1, 32, 256>}, {pipeline_mode = #tpu.pipeline_mode<synchronous>, transform_indices = @transform_2, window_bounds = array<i64: 32, 32>}, {pipeline_mode = #tpu.pipeline_mode<synchronous>, transform_indices = @transform_3, window_bounds = array<i64: 64, 32>}, {transform_indices = @transform_4, window_bounds = array<i64: 1, 1>}, {transform_indices = @transform_5, window_bounds = array<i64: 1, 32, 256>}]} {
    %c0 = arith.constant 0 : index
    %c0_0 = arith.constant 0 : index
    %c0_1 = arith.constant 0 : index
    %0 = vector.load %arg2[%c0, %c0_0, %c0_1] : memref<1x32x256xf32, #tpu.memory_space<vmem>>, vector<1x32x256xf32>
    %1 = vector.shape_cast %0 : vector<1x32x256xf32> to vector<32x256xf32>
    %2 = arith.truncf %1 : vector<32x256xf32> to vector<32x256xbf16>
    %c0_2 = arith.constant 0 : index
    %c0_3 = arith.constant 0 : index
    %c0_4 = arith.constant 0 : index
    %3 = vector.load %arg3[%c0_2, %c0_3, %c0_4] : memref<1x32x256xf32, #tpu.memory_space<vmem>>, vector<1x32x256xf32>
    %4 = vector.shape_cast %3 : vector<1x32x256xf32> to vector<32x256xf32>
    %5 = arith.truncf %4 : vector<32x256xf32> to vector<32x256xbf16>
    %c0_5 = arith.constant 0 : index
    %c0_6 = arith.constant 0 : index
    %6 = vector.load %arg5[%c0_5, %c0_6] : memref<64x32xbf16, #tpu.memory_space<vmem>>, vector<64x32xbf16>
    %cst = arith.constant dense<0.000000e+00> : vector<64x256xf32>
    %7 = tpu.matmul %6, %2, %cst {dimension_numbers = #tpu.dot_dimension_numbers<[1], [0], [0], [1], [0, 0, 1, 1], [], []>} : vector<64x32xbf16>, vector<32x256xbf16>, vector<64x256xf32> -> vector<64x256xf32>
    %8 = vector.extract_strided_slice %7 {offsets = [0, 0], sizes = [32, 256], strides = [1, 1]} : vector<64x256xf32> to vector<32x256xf32>
    %9 = vector.extract_strided_slice %7 {offsets = [32, 0], sizes = [32, 256], strides = [1, 1]} : vector<64x256xf32> to vector<32x256xf32>
    %c0_7 = arith.constant 0 : index
    %c0_8 = arith.constant 0 : index
    %10 = vector.load %arg4[%c0_7, %c0_8] : memref<32x32xbf16, #tpu.memory_space<vmem>>, vector<32x32xbf16>
    %cst_9 = arith.constant dense<0.000000e+00> : vector<32x256xf32>
    %11 = tpu.matmul %10, %5, %cst_9 {dimension_numbers = #tpu.dot_dimension_numbers<[1], [0], [0], [1], [0, 0, 1, 1], [], []>} : vector<32x32xbf16>, vector<32x256xbf16>, vector<32x256xf32> -> vector<32x256xf32>
    %12 = arith.truncf %11 : vector<32x256xf32> to vector<32x256xbf16>
    %13 = arith.truncf %8 : vector<32x256xf32> to vector<32x256xbf16>
    %cst_10 = arith.constant dense<0.000000e+00> : vector<256x256xf32>
    %14 = tpu.matmul %12, %13, %cst_10 {dimension_numbers = #tpu.dot_dimension_numbers<[0], [0], [1], [1], [0, 1, 1, 1], [], []>} : vector<32x256xbf16>, vector<32x256xbf16>, vector<256x256xf32> -> vector<256x256xf32>
    %cst_11 = arith.constant dense<0xFF800000> : vector<256xf32>
    %15 = vector.multi_reduction <maximumf>, %14, %cst_11 [1] : vector<256x256xf32> to vector<256xf32>
    %16 = vector.shape_cast %15 : vector<256xf32> to vector<256x1xf32>
    %17 = vector.broadcast %16 : vector<256x1xf32> to vector<256x256xf32>
    %18 = arith.subf %14, %17 : vector<256x256xf32>
    %19 = math.exp %18 : vector<256x256xf32>
    %20 = arith.truncf %19 : vector<256x256xf32> to vector<256x256xbf16>
    %21 = arith.truncf %9 : vector<32x256xf32> to vector<32x256xbf16>
    %cst_12 = arith.constant dense<0.000000e+00> : vector<32x256xf32>
    %22 = tpu.matmul %21, %20, %cst_12 {dimension_numbers = #tpu.dot_dimension_numbers<[1], [1], [0], [0], [0, 0, 1, 0], [], []>} : vector<32x256xbf16>, vector<256x256xbf16>, vector<32x256xf32> -> vector<32x256xf32>
    %cst_13 = arith.constant 1.000000e+00 : bf16
    %23 = vector.broadcast %cst_13 : bf16 to vector<1x256xbf16>
    %cst_14 = arith.constant dense<0.000000e+00> : vector<1x256xf32>
    %24 = tpu.matmul %23, %20, %cst_14 {dimension_numbers = #tpu.dot_dimension_numbers<[1], [1], [0], [0], [0, 0, 1, 0], [], []>} : vector<1x256xbf16>, vector<256x256xbf16>, vector<1x256xf32> -> vector<1x256xf32>
    %25 = tpu.reciprocal %24 {approx = true} : vector<1x256xf32> -> vector<1x256xf32>
    %26 = vector.broadcast %25 : vector<1x256xf32> to vector<32x256xf32>
    %27 = arith.mulf %22, %26 : vector<32x256xf32>
    %c0_15 = arith.constant 0 : index
    %c0_16 = arith.constant 0 : index
    %28 = memref.load %arg6[%c0_15, %c0_16] : memref<1x1xf32, #tpu.memory_space<smem>>
    %29 = vector.broadcast %28 : f32 to vector<32x256xf32>
    %30 = arith.mulf %29, %27 : vector<32x256xf32>
    %31 = arith.addf %30, %4 : vector<32x256xf32>
    %c0_17 = arith.constant 0 : index
    %c0_18 = arith.constant 0 : index
    %c0_19 = arith.constant 0 : index
    %32 = vector.load %arg7[%c0_17, %c0_18, %c0_19] : memref<1x32x256xf32, #tpu.memory_space<vmem>>, vector<1x32x256xf32>
    %33 = vector.shape_cast %32 : vector<1x32x256xf32> to vector<32x256xf32>
    %34 = vector.shape_cast %31 : vector<32x256xf32> to vector<1x32x256xf32>
    tpu.vector_store %arg7[%c0_17, %c0_18, %c0_19], %34 {strides = array<i32>} : memref<1x32x256xf32, #tpu.memory_space<vmem>>, vector<1x32x256xf32>,
    return
  }
  func.func @transform_0(%arg0: i32, %arg1: i32) -> (i32, i32, i32) {
    %c0_i32 = arith.constant 0 : i32
    %c0_i32_0 = arith.constant 0 : i32
    %c0_i32_1 = arith.constant 0 : i32
    return %arg0, %c0_i32, %c0_i32_0 : i32, i32, i32
  }
  func.func @transform_1(%arg0: i32, %arg1: i32) -> (i32, i32, i32) {
    %c0_i32 = arith.constant 0 : i32
    %c0_i32_0 = arith.constant 0 : i32
    return %arg0, %c0_i32, %arg1 : i32, i32, i32
  }
  func.func @transform_2(%arg0: i32, %arg1: i32) -> (i32, i32) {
    %c0_i32 = arith.constant 0 : i32
    %c0_i32_0 = arith.constant 0 : i32
    %c0_i32_1 = arith.constant 0 : i32
    return %c0_i32, %c0_i32_0 : i32, i32
  }
  func.func @transform_3(%arg0: i32, %arg1: i32) -> (i32, i32) {
    %c0_i32 = arith.constant 0 : i32
    %c0_i32_0 = arith.constant 0 : i32
    %c0_i32_1 = arith.constant 0 : i32
    return %c0_i32, %c0_i32_0 : i32, i32
  }
  func.func @transform_4(%arg0: i32, %arg1: i32) -> (i32, i32) {
    %c0_i32 = arith.constant 0 : i32
    %c0_i32_0 = arith.constant 0 : i32
    %c0_i32_1 = arith.constant 0 : i32
    return %c0_i32, %c0_i32_0 : i32, i32
  }
  func.func @transform_5(%arg0: i32, %arg1: i32) -> (i32, i32, i32) {
    %c0_i32 = arith.constant 0 : i32
    %c0_i32_0 = arith.constant 0 : i32
    return %arg0, %c0_i32, %arg1 : i32, i32, i32
  }
}

</mosaic_0001>

<bundles_post_ra>
// kernel: tpu_custom_call.1
= control target key start
LH: loop header
LB: loop body
LE: loop exit
PB: predicated region body
PF: predicated region fallthrough
CT: control target
= control target key end

     0   :  { %s2472_s0 = inlined_call_operand.hbm [shape: f32[2,32,256], index: 0, kind: input, shape index: {}]   ;;  %s2473_s1 = inlined_call_operand.hbm [shape: f32[2,32,256], index: 1, kind: input, shape index: {}]   ;;  %s2474_s2 = inlined_call_operand.vmem [shape: bf16[32,32], index: 2, kind: input, shape index: {}]   ;;  %s2475_s3 = inlined_call_operand.vmem [shape: bf16[64,32], index: 3, kind: input, shape index: {}]   ;;  %s2476_s4 = inlined_call_operand.<no memory space> [shape: f32[1,1], index: 4, kind: input, shape index: {}]   ;;  %s2477_s5 = inlined_call_operand.hbm [shape: f32[2,32,256], index: 5, kind: output, shape index: {}]  }
   0x1   :  { %10 = sst [smem:[#allocation2]] %s2476_s4 }
   0x2   :  { %11 = vsyncpa [#allocation4], 0 }
   0x3   :  { %13 = vsyncpa [#allocation4 + $0x1], 0 }
   0x4   :  { %14 = vsyncpa [#allocation7], 0 }
   0x5   :  { %16 = vsyncpa [#allocation7 + $0x1], 0 }
   0x6   :  { %17 = vsyncpa [#allocation5], 0 }
   0x7   :  { %19 = vsyncpa [#allocation5 + $0x1], 0  ;;  %s1845_s20 = smov 0   ;;  %s1847_s21 = smov 0  }
   0x8   :  { %s1849_s22 = smov 0   ;;  %s1851_s23 = smov 0  }
   0x9   :  { %s1853_s24 = smov 0   ;;  %s1855_s25 = smov 0  }
   0xa LB: > { %s1386_s4 = sadd.s32 4294967295, %s1801_s25   ;;  %s1387_s26 = sadd.s32 4294967294, %s1801_s25   ;;  %s1801_s25 = sphi %s1855_s25, %s25_s25   ;;  %s1797_s24 = sphi %s1853_s24, %s2538_s24   ;;  %s1793_s23 = sphi %s1851_s23, %s2537_s23   ;;  %s1789_s22 = sphi %s1849_s22, %s2536_s22   ;;  %s1785_s21 = sphi %s1847_s21, %s2535_s21   ;;  %s1781_s20 = sphi %s1845_s20, %s2534_s20  }
   0xb   : > { %s37_s27 = sadd.s32 1, %s1797_s24  ;;  %s44_s28 = sadd.s32 1, %s1789_s22 }
   0xc   : > { %p39_p0 = scmp.ge.s32.totalorder %s37_s27, 2  ;;  %p51_p1 = scmp.ne.s32.totalorder %s1789_s22, %s1785_s21 }
   0xd   : > { %p52_p2 = scmp.eq.s32.totalorder %s1801_s25, 0  ;;  %p57_p3 = scmp.ne.s32.totalorder %s1785_s21, %s1781_s20 }
   0xe   : > { %s2540_s27 = smov (%p39_p0, %s37_s27), 0  ;;  %p58_p5 = scmp.eq.s32.totalorder %s1386_s4, 0 }
   0xf   : > { %p1886_p4 = por %p52_p2, %p51_p1  ;;  %s41_s30 = ssub.s32 %s1797_s24, %s2540_s27 }
  0x10   : > { %p174_p6 = scmp.eq.s32.totalorder %s1386_s4, 1  ;;  %p42_p7 = scmp.eq.s32.totalorder %s41_s30, 0 }
  0x11   : > { %p1892_p8 = por %p58_p5, %p57_p3  ;;  %p180_p10 = scmp.eq.s32.totalorder %s1387_s26, 1 }
  0x12   : > { %p1896_p9 = por %p174_p6, %p51_p1  ;;  %p1453_p13 = scmp.lt.s32.totalorder %s1801_s25, 2 }
  0x13   : > { %s2496_s6 = scalar_select %p1892_p8, 1, 0 }
  0x14   : > { %s2497_s7 = scalar_select %p1896_p9, 1, 0 }
  0x15   : > { %s1901_s8 = scalar_select %p42_p7, %s1789_s22, %s44_s28  }
  0x16   : > { %p1903_p11 = por %p180_p10, %p57_p3  ;;  %s1910_s10 = sand.u32 1, %s1789_s22  }
  0x17   : > { %s1390_s11 = sshll.u32 %s1910_s10, 6  ;;  %s1433_s12 = sshll.u32 %s1797_s24, 10 }
  0x18   : > { %s2498_s9 = scalar_select %p1903_p11, 1, 0 }
  0x19   : > { %s1919_s15 = scalar_lea.hbm %s2472_s0, %s1433_s12  ;;  %s213_s16 = scalar_lea.vmem [#allocation3], %s1390_s11 }
  0x1a   : > { %s220_s17 = sshll.u32 %s213_s16, 4  ;;  %p1927_p0 = pnand %p1453_p13, %p1886_p4  ;;  %s1923_s17 = int_to_ptr.vmem [resolvable:$true] %s220_s17 }
  0x1b   : > { %s210_s19 = scalar_lea.sflag [#allocation4], %s1910_s10  ;;  %s1655_s4 = scalar_lea.hbm %s1919_s15, 1024 }
  0x1c   : > { %p1656_p2 = scmp.ne.s32.totalorder %s1919_s15, %s1655_s4  ;;  %p1657_p3 = pneg %p1927_p0 }
  0x1d   : > { %s1660_s29 = scalar_lea.hbm %s2472_s0, 2048  ;;  %p1661_p4 = scmp.lt.u32.totalorder %s1919_s15, %s2472_s0 }
  0x1e   : > { %p1658_p5 = pnand %p1657_p3, %p1656_p2  ;;  %p1662_p7 = scmp.lt.u32.totalorder %s1660_s29, %s1655_s4 }
  0x1f   : > { %p1664_p13 = scmp.lt.u32.totalorder %s1655_s4, %s1919_s15 }
  0x20   : > { %p1659_p6 = pneg %p1658_p5  ;;  %p1663_p10 = por %p1662_p7, %p1661_p4 }
  0x22   : > { %p1665_p12 = por %p1664_p13, %p1663_p10 }
  0x24   : > { %p1666_p1 = pnand %p1665_p12, %p1659_p6 }
  0x26   : > { %1669 = shalt.err (!%p1666_p1)
}
  0x27   : > { %s1670_s14 = scalar_lea.vmem %s1923_s17, 1024  ;;  %s1803_s16 = smov [#allocation3]  }
  0x28   : > { %p1671_p2 = scmp.ne.s32.totalorder %s1923_s17, %s1670_s14  ;;  %s1675_s26 = sshll.u32 %s1803_s16, 4  ;;  %s1676_s26 = int_to_ptr.vmem [resolvable:$false] %s1675_s26 }
  0x29   : > { %s1677_s28 = scalar_lea.vmem %s1676_s26, 2048  ;;  %p1678_p9 = scmp.lt.s32.totalorder %s1923_s17, %s1676_s26 }
  0x2a   : > { %p1673_p5 = pnand %p1671_p2, %p1657_p3  ;;  %p1679_p4 = scmp.lt.s32.totalorder %s1677_s28, %s1670_s14 }
  0x2c   : > { %p1674_p11 = pneg %p1673_p5  ;;  %p1680_p7 = por %p1679_p4, %p1678_p9 }
  0x2e   : > { %p1681_p10 = pnand %p1680_p7, %p1674_p11 }
  0x30   : > { %1684 = shalt.err (!%p1681_p10)
}
  0x31   : > { %s2479_s4 = smov 256   ;;  %s1805_s29 = smov 16  }
  0x32   : > { %1445 = dma.hbm_to_vmem [thread:$0]  (!%p1927_p0), %s1919_s15, 1024, %s1923_s17, %s210_s19, %s2479_s4, %s2479_s4, %s1805_s29  }
  0x33   : > { %p251_p9 = scmp.lt.s32.totalorder %s1801_s25, 3  ;;  %s1969_s14 = scalar_lea.hbm %s2473_s1, %s1433_s12 }
  0x34   : > { %p2500_p11 = scmp.ge.s32.totalorder %s1801_s25, 1  ;;  %s234_s26 = scalar_lea.vmem [#allocation6], %s1390_s11 }
  0x35   : > { %s243_s28 = sshll.u32 %s234_s26, 4  ;;  %s231_s15 = scalar_lea.sflag [#allocation7], %s1910_s10  ;;  %s1979_s28 = int_to_ptr.vmem [resolvable:$true] %s243_s28 }
  0x36   : > { %p1973_p12 = pnand %p2500_p11, %p251_p9  ;;  %s1685_s17 = scalar_lea.hbm %s1969_s14, 1024 }
  0x37   : > { %p1686_p1 = scmp.ne.s32.totalorder %s1969_s14, %s1685_s17  ;;  %s1690_s30 = scalar_lea.hbm %s2473_s1, 2048 }
  0x38   : > { %p1691_p2 = scmp.lt.u32.totalorder %s1969_s14, %s2473_s1  ;;  %p1692_p5 = scmp.lt.u32.totalorder %s1690_s30, %s1685_s17 }
  0x39   : > { %p1688_p6 = pnand %p1686_p1, %p1657_p3  ;;  %p1694_p7 = scmp.lt.u32.totalorder %s1685_s17, %s1969_s14 }
  0x3a   : > { %p1693_p4 = por %p1692_p5, %p1691_p2 }
  0x3b   : > { %p1689_p13 = pneg %p1688_p6 }
  0x3c   : > { %p1695_p10 = por %p1694_p7, %p1693_p4 }
  0x3e   : > { %p1696_p9 = pnand %p1695_p10, %p1689_p13 }
  0x40   : > { %1699 = shalt.err (!%p1696_p9)
}
  0x41   : > { %s1700_s11 = scalar_lea.vmem %s1979_s28, 1024  ;;  %s1806_s26 = smov [#allocation6]  }
  0x42   : > { %p1701_p11 = scmp.ne.s32.totalorder %s1979_s28, %s1700_s11  ;;  %s1705_s12 = sshll.u32 %s1806_s26, 4  ;;  %s1706_s12 = int_to_ptr.vmem [resolvable:$false] %s1705_s12 }
  0x43   : > { %s1707_s4 = scalar_lea.vmem %s1706_s12, 2048  ;;  %p1708_p8 = scmp.lt.s32.totalorder %s1979_s28, %s1706_s12 }
  0x44   : > { %p1703_p1 = pnand %p1701_p11, %p1657_p3  ;;  %p1709_p2 = scmp.lt.s32.totalorder %s1707_s4, %s1700_s11 }
  0x46   : > { %p1704_p6 = pneg %p1703_p1  ;;  %p1710_p5 = por %p1709_p2, %p1708_p8 }
  0x48   : > { %p1711_p4 = pnand %p1710_p5, %p1704_p6 }
  0x4a   : > { %1714 = shalt.err (!%p1711_p4)
}
  0x4b   : > { %s2502_s17 = smov 256   ;;  %255 = sbr.rel (%p1973_p12) target bundleno = 1177 (0x499), region = 40 }
  0x4c   : > { %1448 = dma.hbm_to_vmem [thread:$0]  (!%p1927_p0), %s1969_s14, 1024, %s1979_s28, %s231_s15, %s2502_s17, %s2502_s17, %s1805_s29  }
  0x52   : > { %s2013_s19 = sand.u32 1, %s1785_s21   ;;  %p2503_p8 = scmp.ne.s32.totalorder %s2496_s6, 0 }
  0x53   : > { %s2016_s30 = sshll.u32 %s2013_s19, 6  ;;  %s258_s18 = scalar_lea.sflag [#allocation4], %s2013_s19 }
  0x54   : > { %s2020_s13 = scalar_lea.vmem [#allocation3], %s2016_s30 }
  0x55   : > { %1768 = dma.done.wait (%p2503_p8), %s258_s18, 1024  }
  0x56   : > { %1770 = vsyncadd (%p2503_p8), %s258_s18, 4294966272  ;;  %s267_s10 = scalar_lea.sflag [#allocation7], %s2013_s19  ;;  %s2028_s29 = scalar_lea.vmem [#allocation6], %s2016_s30 }
  0x57   : > { %1772 = dma.done.wait (%p2503_p8), %s267_s10, 1024  }
  0x58   : > { %1774 = vsyncadd (%p2503_p8), %s267_s10, 4294966272  ;;  %v1807_v0 = vmov 0   ;;  %v319_v1 = vld [vmem:[%s2028_s29 + $0x8] sm:$0xff]  ;;  %v321_v2 = vld [vmem:[%s2028_s29 + $0x18] sm:$0xff]  ;;  %vm358_vm0 = vcmask 261120   ;;  %s1234_s10 = sld [smem:[#allocation2]] }
  0x59   : > { %496 = vmatprep.mubr.bf16.mxu1 %v1807_v0  ;;  %403 = vmatprep.mubr.bf16.mxu0 %v1807_v0  ;;  %v318_v3 = vld [vmem:[%s2028_s29] sm:$0xff]  ;;  %v327_v4 = vpack.c.bf16 %v321_v2, %v319_v1  ;;  %v320_v5 = vld [vmem:[%s2028_s29 + $0x10] sm:$0xff]  ;;  %v323_v6 = vld [vmem:[%s2028_s29 + $0x28] sm:$0xff]  ;;  %s1435_s6 = sshll.u32 %s1793_s23, 10  ;;  %s2399_s14 = scalar_lea.vmem [#allocation8], %s2016_s30 }
  0x5a   : > { %v325_v7 = vld [vmem:[%s2028_s29 + $0x38] sm:$0xff]  ;;  %v326_v8 = vpack.c.bf16 %v320_v5, %v318_v3  ;;  %v322_v10 = vld [vmem:[%s2028_s29 + $0x20] sm:$0xff]  ;;  %v324_v11 = vld [vmem:[%s2028_s29 + $0x30] sm:$0xff]  ;;  %s1276_s16 = sshll.u32 %s2399_s14, 4  ;;  %s2409_s28 = scalar_lea.hbm %s2477_s5, %s1435_s6  ;;  %s2411_s16 = int_to_ptr.vmem [resolvable:$true] %s1276_s16 }
  0x5b   : > { %v329_v9 = vpack.c.bf16 %v325_v7, %v323_v6  ;;  %464 = vmatprep.subr.bf16.mxu1 %v327_v4  ;;  %v328_v12 = vpack.c.bf16 %v324_v11, %v322_v10  ;;  %v307_v13 = vld [vmem:[%s2020_s13 + $0x8] sm:$0xff]  ;;  %v1509_v14 = vld [vmem:[%s2474_s2] sm:$0xff]   ;;  %v309_v15 = vld [vmem:[%s2020_s13 + $0x18] sm:$0xff]  ;;  %s1261_s15 = scalar_lea.sflag [#allocation5], %s2013_s19  ;;  %s1715_s11 = scalar_lea.vmem %s2411_s16, 1024 }
  0x5c   : > { %465 = vmatpush1.bf16.msra.mxu1 %v326_v8  ;;  %v306_v16 = vld [vmem:[%s2020_s13] sm:$0xff]  ;;  %v308_v17 = vld [vmem:[%s2020_s13 + $0x10] sm:$0xff]  ;;  %v315_v18 = vpack.c.bf16 %v309_v15, %v307_v13  ;;  %v311_v20 = vld [vmem:[%s2020_s13 + $0x28] sm:$0xff]  ;;  %p1716_p0 = scmp.ne.s32.totalorder %s2411_s16, %s1715_s11  ;;  %p2531_p3 = scmp.ne.s32.totalorder %s2497_s7, 0 }
  0x5d   : > { %466 = vmatprep.subr.bf16.mxu1 %v329_v9  ;;  %v314_v19 = vpack.c.bf16 %v308_v17, %v306_v16  ;;  %v313_v21 = vld [vmem:[%s2020_s13 + $0x38] sm:$0xff]  ;;  %v310_v22 = vld [vmem:[%s2020_s13 + $0x20] sm:$0xff]  ;;  %v312_v24 = vld [vmem:[%s2020_s13 + $0x30] sm:$0xff]  ;;  %s1809_s26 = smov [#allocation8]  }
  0x5e   : > { %v317_v23 = vpack.c.bf16 %v313_v21, %v311_v20  ;;  %371 = vmatprep.subr.bf16.mxu0 %v315_v18  ;;  %v316_v25 = vpack.c.bf16 %v312_v24, %v310_v22  ;;  %v1511_v26 = vld [vmem:[%s2475_s3] sm:$0xff]   ;;  %v1510_v27 = vld [vmem:[%s2474_s2 + $0x8] sm:$0xff]   ;;  %v1513_v6 = vld [vmem:[%s2475_s3 + $0x10] sm:$0xff]   ;;  %p1717_p12 = pnand %p1716_p0, %p2531_p3  ;;  %s1719_s12 = sshll.u32 %s1809_s26, 4  ;;  %s1720_s12 = int_to_ptr.vmem [resolvable:$false] %s1719_s12 }
  0x5f   : > { %372 = vmatpush1.bf16.msra.mxu0 %v314_v19  ;;  %v1512_v28 = vld [vmem:[%s2475_s3 + $0x8] sm:$0xff]   ;;  %v1514_v7 = vld [vmem:[%s2475_s3 + $0x18] sm:$0xff]   ;;  %p1722_p7 = scmp.lt.s32.totalorder %s2411_s16, %s1720_s12 }
  0x60   : > { %467 = vmatpush1.bf16.msra.mxu1 %v328_v12  ;;  %373 = vmatprep.subr.bf16.mxu0 %v317_v23  ;;  %p1718_p13 = pneg %p1717_p12 }
  0x63   : > { %1410 = vmatmul.mubr.msk.bf16.vlgmr.msra.gmra.mrb[0].mxu1 %vm358_vm0, %v1509_v14  ;;  %374 = vmatpush1.bf16.msra.mxu0 %v316_v25 }
  0x64   : > { %506 = vmatprep.mubr.bf16.mxu1 %v1807_v0 }
  0x66   : > { %1404 = vmatmul.mubr.msk.bf16.vlgmr.msra.gmra.mrb[0].mxu0 %vm358_vm0, %v1511_v26 }
  0x67   : > { %413 = vmatprep.mubr.bf16.mxu0 %v1807_v0 }
  0x6b   : > { %1411 = vmatmul.mubr.msk.bf16.gmra.mrb[4].mxu1 %vm358_vm0, %v1510_v27 }
  0x6c   : > { %637 = vmatprep.mubr.bf16.mxu1 %v1807_v0 }
  0x6e   : > { %1405 = vmatmul.mubr.msk.bf16.gmra.mrb[4].mxu0 %vm358_vm0, %v1512_v28 }
  0x6f   : > { %423 = vmatprep.mubr.bf16.mxu0 %v1807_v0 }
  0x76   : > { %1406 = vmatmul.mubr.msk.bf16.gmra.mrb[8].mxu0 %vm358_vm0, %v1513_v6 }
  0x77   : > { %433 = vmatprep.mubr.bf16.mxu0 %v1807_v0 }
  0x7e   : > { %1407 = vmatmul.mubr.msk.bf16.gmra.mrb[12].mxu0 %vm358_vm0, %v1514_v7 }
 0x136   : > { %v498_v29 = vpop.f32.mrb[0].mxu1 }
 0x137   : > { %v500_v30 = vpop.f32.mrb[1].mxu1 }
 0x138   : > { %v502_v31 = vpop.f32.mrb[2].mxu1 }
 0x139   : > { %v504_v32 = vpop.f32.mrb[3].mxu1  ;;  %v517_v33 = vpack.c.bf16 %v502_v31, %v498_v29  ;;  %v405_v35 = vpop.f32.mrb[0].mxu0 }
 0x13a   : > { %v518_v34 = vpack.c.bf16 %v504_v32, %v500_v30  ;;  %v407_v36 = vpop.f32.mrb[1].mxu0 }
 0x13b   : > { %525 = vxpose.xlu0.c.b16.start [1/2] (short) %v517_v33, 128  ;;  %v409_v37 = vpop.f32.mrb[2].mxu0 }
 0x13c   : > { %541 = vxpose.xlu1.c.b16.start [1/2] (short) %v518_v34, 128  ;;  %v521_v39 = vpack.c.bf16 %v409_v37, %v405_v35  ;;  %v411_v40 = vpop.f32.mrb[3].mxu0 }
 0x13d   : > { %v522_v42 = vpack.c.bf16 %v411_v40, %v407_v36 }
 0x13e   : > { %v508_v38 = vpop.f32.mrb[4].mxu1 }
 0x13f   : > { %v510_v41 = vpop.f32.mrb[5].mxu1  ;;  %605 = vmatprep.subr.bf16.mxu1 %v522_v42 }
 0x140   : > { %v512_v43 = vpop.f32.mrb[6].mxu1  ;;  %606 = vmatpush1.bf16.msra.mxu1 %v521_v39 }
 0x141   : > { %v519_v44 = vpack.c.bf16 %v512_v43, %v508_v38  ;;  %v514_v45 = vpop.f32.mrb[7].mxu1  ;;  %v415_v47 = vpop.f32.mrb[4].mxu0 }
 0x142   : > { %v520_v46 = vpack.c.bf16 %v514_v45, %v510_v41  ;;  %v417_v48 = vpop.f32.mrb[5].mxu0 }
 0x143   : > { %526 = vxpose.xlu0.c.b16.end [2/2] (short) %v519_v44, 128  ;;  %v419_v49 = vpop.f32.mrb[6].mxu0 }
 0x144   : > { %542 = vxpose.xlu1.c.b16.end [2/2] (short) %v520_v46, 128  ;;  %v523_v50 = vpack.c.bf16 %v419_v49, %v415_v47  ;;  %v421_v51 = vpop.f32.mrb[7].mxu0 }
 0x145   : > { %v524_v52 = vpack.c.bf16 %v421_v51, %v417_v48 }
 0x147   : > { %607 = vmatprep.subr.bf16.mxu1 %v524_v52 }
 0x148   : > { %608 = vmatpush1.bf16.msra.mxu1 %v523_v50 }
 0x1a5   : > { %v533_v53 = vpop.trf.xlu0 }
 0x1a6   : > { %1412 = vmatmul.mubr.msk.bf16.vlgmr.msra.gmra.mrb[8].mxu1 %vm358_vm0, %v533_v53  ;;  %v549_v61 = vpop.trf.xlu1 }
 0x1a7   : > { %647 = vmatprep.mubr.bf16.mxu1 %v1807_v0 }
 0x1a9   : > { %v534_v54 = vpop.trf.xlu0 }
 0x1aa   : > { %v550_v62 = vpop.trf.xlu1 }
 0x1ad   : > { %v535_v55 = vpop.trf.xlu0 }
 0x1ae   : > { %1413 = vmatmul.mubr.msk.bf16.gmra.mrb[12].mxu1 %vm358_vm0, %v534_v54  ;;  %v551_v63 = vpop.trf.xlu1 }
 0x1af   : > { %657 = vmatprep.mubr.bf16.mxu1 %v1807_v0 }
 0x1b1   : > { %v536_v56 = vpop.trf.xlu0 }
 0x1b2   : > { %v552_v1 = vpop.trf.xlu1 }
 0x1b5   : > { %v537_v57 = vpop.trf.xlu0 }
 0x1b6   : > { %1414 = vmatmul.mubr.msk.bf16.gmra.mrb[16].mxu1 %vm358_vm0, %v535_v55  ;;  %v553_v2 = vpop.trf.xlu1 }
 0x1b7   : > { %667 = vmatprep.mubr.bf16.mxu1 %v1807_v0 }
 0x1b9   : > { %v538_v58 = vpop.trf.xlu0 }
 0x1ba   : > { %v554_v3 = vpop.trf.xlu1 }
 0x1bd   : > { %v539_v59 = vpop.trf.xlu0 }
 0x1be   : > { %1415 = vmatmul.mubr.msk.bf16.gmra.mrb[20].mxu1 %vm358_vm0, %v536_v56  ;;  %v555_v4 = vpop.trf.xlu1 }
 0x1bf   : > { %677 = vmatprep.mubr.bf16.mxu1 %v1807_v0 }
 0x1c1   : > { %v540_v60 = vpop.trf.xlu0 }
 0x1c2   : > { %v556_v5 = vpop.trf.xlu1 }
 0x1c6   : > { %1416 = vmatmul.mubr.msk.bf16.gmra.mrb[24].mxu1 %vm358_vm0, %v537_v57 }
 0x1c7   : > { %687 = vmatprep.mubr.bf16.mxu1 %v1807_v0 }
 0x1ce   : > { %1417 = vmatmul.mubr.msk.bf16.gmra.mrb[28].mxu1 %vm358_vm0, %v538_v58 }
 0x1cf   : > { %697 = vmatprep.mubr.bf16.mxu1 %v1807_v0 }
 0x1d6   : > { %1418 = vmatmul.mubr.msk.bf16.gmra.mrb[32].mxu1 %vm358_vm0, %v539_v59 }
 0x1d7   : > { %707 = vmatprep.mubr.bf16.mxu1 %v1807_v0 }
 0x1de   : > { %1419 = vmatmul.mubr.msk.bf16.gmra.mrb[36].mxu1 %vm358_vm0, %v540_v60 }
 0x1df   : > { %717 = vmatprep.mubr.bf16.mxu1 %v1807_v0 }
 0x1e6   : > { %1420 = vmatmul.mubr.msk.bf16.gmra.mrb[40].mxu1 %vm358_vm0, %v549_v61 }
 0x1e7   : > { %727 = vmatprep.mubr.bf16.mxu1 %v1807_v0 }
 0x1ee   : > { %1421 = vmatmul.mubr.msk.bf16.gmra.mrb[44].mxu1 %vm358_vm0, %v550_v62 }
 0x1ef   : > { %737 = vmatprep.mubr.bf16.mxu1 %v1807_v0 }
 0x1f6   : > { %1422 = vmatmul.mubr.msk.bf16.gmra.mrb[48].mxu1 %vm358_vm0, %v551_v63 }
 0x1f7   : > { %747 = vmatprep.mubr.bf16.mxu1 %v1807_v0 }
 0x1fe   : > { %1423 = vmatmul.mubr.msk.bf16.gmra.mrb[52].mxu1 %vm358_vm0, %v552_v1 }
 0x1ff   : > { %757 = vmatprep.mubr.bf16.mxu1 %v1807_v0 }
 0x206   : > { %1424 = vmatmul.mubr.msk.bf16.gmra.mrb[56].mxu1 %vm358_vm0, %v553_v2 }
 0x207   : > { %767 = vmatprep.mubr.bf16.mxu1 %v1807_v0 }
 0x20e   : > { %1425 = vmatmul.mubr.msk.bf16.gmra.mrb[60].mxu1 %vm358_vm0, %v554_v3 }
 0x20f   : > { %777 = vmatprep.mubr.bf16.mxu1 %v1807_v0 }
 0x216   : > { %1426 = vmatmul.mubr.msk.bf16.gmra.mrb[64].mxu1 %vm358_vm0, %v555_v4 }
 0x217   : > { %787 = vmatprep.mubr.bf16.mxu1 %v1807_v0 }
 0x21e   : > { %1427 = vmatmul.mubr.msk.bf16.gmra.mrb[68].mxu1 %vm358_vm0, %v556_v5 }
 0x279   : > { %v2112_v8 = vpop.f32.mrb[8].mxu1 }
 0x27a   : > { %v2114_v9 = vpop.f32.mrb[9].mxu1 }
 0x27b   : > { %v2116_v10 = vpop.f32.mrb[10].mxu1  ;;  %v798_v11 = vmax.f32 %v2112_v8, %v2114_v9 }
 0x27c   : > { %v2120_v12 = vpop.f32.mrb[11].mxu1 }
 0x27d   : > { %799 = vmax.xlane.f32.xlu0 %v798_v11  ;;  %v801_v0 = vmax.f32 %v2116_v10, %v2120_v12 }
 0x27f   : > { %802 = vmax.xlane.f32.xlu1 %v801_v0 }
 0x281   : > { %v2124_v13 = vpop.f32.mrb[12].mxu1 }
 0x282   : > { %v2126_v14 = vpop.f32.mrb[13].mxu1 }
 0x283   : > { %v2128_v15 = vpop.f32.mrb[14].mxu1  ;;  %v804_v16 = vmax.f32 %v2124_v13, %v2126_v14 }
 0x284   : > { %v2132_v17 = vpop.f32.mrb[15].mxu1 }
 0x285   : > { %805 = vmax.xlane.f32.xlu0 %v804_v16  ;;  %v807_v18 = vmax.f32 %v2128_v15, %v2132_v17 }
 0x287   : > { %808 = vmax.xlane.f32.xlu1 %v807_v18 }
 0x289   : > { %v2136_v19 = vpop.f32.mrb[16].mxu1 }
 0x28a   : > { %v2138_v20 = vpop.f32.mrb[17].mxu1 }
 0x28b   : > { %v2140_v21 = vpop.f32.mrb[18].mxu1  ;;  %v810_v22 = vmax.f32 %v2136_v19, %v2138_v20 }
 0x28c   : > { %v2144_v23 = vpop.f32.mrb[19].mxu1 }
 0x28d   : > { %811 = vmax.xlane.f32.xlu0 %v810_v22  ;;  %v813_v24 = vmax.f32 %v2140_v21, %v2144_v23 }
 0x28f   : > { %814 = vmax.xlane.f32.xlu1 %v813_v24 }
 0x291   : > { %v2148_v25 = vpop.f32.mrb[20].mxu1 }
 0x292   : > { %v2150_v26 = vpop.f32.mrb[21].mxu1 }
 0x293   : > { %v2152_v27 = vpop.f32.mrb[22].mxu1  ;;  %v816_v28 = vmax.f32 %v2148_v25, %v2150_v26 }
 0x294   : > { %v2156_v29 = vpop.f32.mrb[23].mxu1 }
 0x295   : > { %817 = vmax.xlane.f32.xlu0 %v816_v28  ;;  %v819_v30 = vmax.f32 %v2152_v27, %v2156_v29 }
 0x297   : > { %820 = vmax.xlane.f32.xlu1 %v819_v30 }
 0x299   : > { %v2160_v31 = vpop.f32.mrb[24].mxu1 }
 0x29a   : > { %v2162_v32 = vpop.f32.mrb[25].mxu1 }
 0x29b   : > { %v2164_v33 = vpop.f32.mrb[26].mxu1  ;;  %v822_v34 = vmax.f32 %v2160_v31, %v2162_v32 }
 0x29c   : > { %v2168_v35 = vpop.f32.mrb[27].mxu1 }
 0x29d   : > { %823 = vmax.xlane.f32.xlu0 %v822_v34  ;;  %v825_v36 = vmax.f32 %v2164_v33, %v2168_v35 }
 0x29f   : > { %826 = vmax.xlane.f32.xlu1 %v825_v36 }
 0x2a1   : > { %v2172_v37 = vpop.f32.mrb[28].mxu1 }
 0x2a2   : > { %v2174_v38 = vpop.f32.mrb[29].mxu1 }
 0x2a3   : > { %v2176_v39 = vpop.f32.mrb[30].mxu1  ;;  %v828_v40 = vmax.f32 %v2172_v37, %v2174_v38 }
 0x2a4   : > { %v2180_v41 = vpop.f32.mrb[31].mxu1 }
 0x2a5   : > { %829 = vmax.xlane.f32.xlu0 %v828_v40  ;;  %v831_v42 = vmax.f32 %v2176_v39, %v2180_v41 }
 0x2a7   : > { %832 = vmax.xlane.f32.xlu1 %v831_v42 }
 0x2a9   : > { %v2184_v43 = vpop.f32.mrb[32].mxu1 }
 0x2aa   : > { %v2186_v44 = vpop.f32.mrb[33].mxu1 }
 0x2ab   : > { %v2188_v45 = vpop.f32.mrb[34].mxu1  ;;  %v834_v46 = vmax.f32 %v2184_v43, %v2186_v44 }
 0x2ac   : > { %v2192_v47 = vpop.f32.mrb[35].mxu1 }
 0x2ad   : > { %835 = vmax.xlane.f32.xlu0 %v834_v46  ;;  %v837_v48 = vmax.f32 %v2188_v45, %v2192_v47 }
 0x2af   : > { %838 = vmax.xlane.f32.xlu1 %v837_v48 }
 0x2b1   : > { %v2196_v49 = vpop.f32.mrb[36].mxu1 }
 0x2b2   : > { %v2198_v50 = vpop.f32.mrb[37].mxu1 }
 0x2b3   : > { %v2200_v51 = vpop.f32.mrb[38].mxu1  ;;  %v840_v52 = vmax.f32 %v2196_v49, %v2198_v50 }
 0x2b4   : > { %v2204_v53 = vpop.f32.mrb[39].mxu1 }
 0x2b5   : > { %841 = vmax.xlane.f32.xlu0 %v840_v52  ;;  %v843_v54 = vmax.f32 %v2200_v51, %v2204_v53 }
 0x2b7   : > { %844 = vmax.xlane.f32.xlu1 %v843_v54 }
 0x2b9   : > { %v2208_v55 = vpop.f32.mrb[40].mxu1 }
 0x2ba   : > { %v2210_v56 = vpop.f32.mrb[41].mxu1 }
 0x2bb   : > { %v2212_v57 = vpop.f32.mrb[42].mxu1  ;;  %v846_v58 = vmax.f32 %v2208_v55, %v2210_v56 }
 0x2bc   : > { %v2216_v59 = vpop.f32.mrb[43].mxu1 }
 0x2bd   : > { %847 = vmax.xlane.f32.xlu0 %v846_v58  ;;  %v849_v60 = vmax.f32 %v2212_v57, %v2216_v59 }
 0x2bf   : > { %850 = vmax.xlane.f32.xlu1 %v849_v60 }
 0x2c1   : > { %v2220_v61 = vpop.f32.mrb[44].mxu1 }
 0x2c2   : > { %v2222_v62 = vpop.f32.mrb[45].mxu1 }
 0x2c3   : > { %v2224_v63 = vpop.f32.mrb[46].mxu1  ;;  %v852_v1 = vmax.f32 %v2220_v61, %v2222_v62 }
 0x2c4   : > { %v2228_v2 = vpop.f32.mrb[47].mxu1 }
 0x2c5   : > { %853 = vmax.xlane.f32.xlu0 %v852_v1  ;;  %v855_v3 = vmax.f32 %v2224_v63, %v2228_v2 }
 0x2c7   : > { %856 = vmax.xlane.f32.xlu1 %v855_v3 }
 0x2c9   : > { %v2232_v4 = vpop.f32.mrb[48].mxu1 }
 0x2ca   : > { %v2234_v5 = vpop.f32.mrb[49].mxu1 }
 0x2cb   : > { %v2236_v6 = vpop.f32.mrb[50].mxu1  ;;  %v858_v7 = vmax.f32 %v2232_v4, %v2234_v5 }
 0x2cc   : > { %v2240_v11 = vpop.f32.mrb[51].mxu1 }
 0x2cd   : > { %859 = vmax.xlane.f32.xlu0 %v858_v7  ;;  %v861_v0 = vmax.f32 %v2236_v6, %v2240_v11 }
 0x2cf   : > { %862 = vmax.xlane.f32.xlu1 %v861_v0 }
 0x2d1   : > { %v2244_v16 = vpop.f32.mrb[52].mxu1 }
 0x2d2   : > { %v2246_v18 = vpop.f32.mrb[53].mxu1 }
 0x2d3   : > { %v2248_v22 = vpop.f32.mrb[54].mxu1  ;;  %v864_v24 = vmax.f32 %v2244_v16, %v2246_v18 }
 0x2d4   : > { %v2252_v28 = vpop.f32.mrb[55].mxu1 }
 0x2d5   : > { %865 = vmax.xlane.f32.xlu0 %v864_v24  ;;  %v867_v30 = vmax.f32 %v2248_v22, %v2252_v28 }
 0x2d7   : > { %868 = vmax.xlane.f32.xlu1 %v867_v30 }
 0x2d9   : > { %v2256_v34 = vpop.f32.mrb[56].mxu1 }
 0x2da   : > { %v2258_v36 = vpop.f32.mrb[57].mxu1 }
 0x2db   : > { %v2260_v40 = vpop.f32.mrb[58].mxu1  ;;  %v870_v42 = vmax.f32 %v2256_v34, %v2258_v36 }
 0x2dc   : > { %2504 = vst [vmem:[#allocation12_spill] sm:$0xff] %v2260_v40  ;;  %v2264_v46 = vpop.f32.mrb[59].mxu1 }
 0x2dd   : > { %2505 = vst [vmem:[#allocation13_spill] sm:$0xff] %v2264_v46  ;;  %871 = vmax.xlane.f32.xlu0 %v870_v42  ;;  %v873_v48 = vmax.f32 %v2260_v40, %v2264_v46 }
 0x2df   : > { %874 = vmax.xlane.f32.xlu1 %v873_v48 }
 0x2e1   : > { %v2268_v52 = vpop.f32.mrb[60].mxu1 }
 0x2e2   : > { %2506 = vst [vmem:[#allocation14_spill] sm:$0xff] %v2268_v52  ;;  %v2270_v54 = vpop.f32.mrb[61].mxu1 }
 0x2e3   : > { %2507 = vst [vmem:[#allocation15_spill] sm:$0xff] %v2270_v54  ;;  %v2272_v58 = vpop.f32.mrb[62].mxu1  ;;  %v876_v60 = vmax.f32 %v2268_v52, %v2270_v54 }
 0x2e4   : > { %2508 = vst [vmem:[#allocation16_spill] sm:$0xff] %v2272_v58  ;;  %v2276_v1 = vpop.f32.mrb[63].mxu1 }
 0x2e5   : > { %2509 = vst [vmem:[#allocation17_spill] sm:$0xff] %v2276_v1  ;;  %877 = vmax.xlane.f32.xlu0 %v876_v60  ;;  %v879_v3 = vmax.f32 %v2272_v58, %v2276_v1 }
 0x2e7   : > { %880 = vmax.xlane.f32.xlu1 %v879_v3 }
 0x2e9   : > { %v2280_v7 = vpop.f32.mrb[64].mxu1 }
 0x2ea   : > { %2510 = vst [vmem:[#allocation18_spill] sm:$0xff] %v2280_v7  ;;  %v2282_v0 = vpop.f32.mrb[65].mxu1 }
 0x2eb   : > { %2511 = vst [vmem:[#allocation19_spill] sm:$0xff] %v2282_v0  ;;  %v2284_v24 = vpop.f32.mrb[66].mxu1  ;;  %v882_v30 = vmax.f32 %v2280_v7, %v2282_v0 }
 0x2ec   : > { %2512 = vst [vmem:[#allocation20_spill] sm:$0xff] %v2284_v24  ;;  %v2288_v42 = vpop.f32.mrb[67].mxu1 }
 0x2ed   : > { %2513 = vst [vmem:[#allocation21_spill] sm:$0xff] %v2288_v42  ;;  %883 = vmax.xlane.f32.xlu0 %v882_v30  ;;  %v885_v48 = vmax.f32 %v2284_v24, %v2288_v42 }
 0x2ef   : > { %886 = vmax.xlane.f32.xlu1 %v885_v48 }
 0x2f1   : > { %v2292_v60 = vpop.f32.mrb[68].mxu1 }
 0x2f2   : > { %2514 = vst [vmem:[#allocation22_spill] sm:$0xff] %v2292_v60  ;;  %v2294_v1 = vpop.f32.mrb[69].mxu1 }
 0x2f3   : > { %2515 = vst [vmem:[#allocation23_spill] sm:$0xff] %v2294_v1  ;;  %v2296_v3 = vpop.f32.mrb[70].mxu1  ;;  %v888_v58 = vmax.f32 %v2292_v60, %v2294_v1 }
 0x2f4   : > { %v2300_v54 = vpop.f32.mrb[71].mxu1 }
 0x2f5   : > { %2516 = vst [vmem:[#allocation24_spill] sm:$0xff] %v2300_v54  ;;  %889 = vmax.xlane.f32.xlu0 %v888_v58  ;;  %v891_v0 = vmax.f32 %v2296_v3, %v2300_v54 }
 0x2f7   : > { %892 = vmax.xlane.f32.xlu1 %v891_v0 }
 0x30a   : > { %v800_v30 = vpop.xlane.xlu0 %799 }
 0x30b   : > { %v894_v42 = vsub.f32 %v2112_v8, %v800_v30  ;;  %v895_v48 = vsub.f32 %v2114_v9, %v800_v30 }
 0x30c   : > { %v803_v24 = vpop.xlane.xlu1 %802 }
 0x30d   : > { %v958_v7 = vmul.f32 1.442695, %v894_v42  ;;  %v896_v52 = vsub.f32 %v2116_v10, %v803_v24  ;;  %v897_v46 = vsub.f32 %v2120_v12, %v803_v24  ;;  %v960_v40 = vmul.f32 1.442695, %v895_v48 }
 0x30f   : > { %v962_v1 = vmul.f32 1.442695, %v896_v52  ;;  %v964_v60 = vmul.f32 1.442695, %v897_v46  ;;  %1515 = vpow2.f32 %v958_v7  ;;  %v2312_v52 = vpop.f32.mrb[8].mxu0 }
 0x310   : > { %v427_v46 = vpop.f32.mrb[9].mxu0 }
 0x311   : > { %1517 = vpow2.f32 %v962_v1 }
 0x312   : > { %1519 = vpow2.f32 %v964_v60  ;;  %v806_v58 = vpop.xlane.xlu0 %805 }
 0x313   : > { %1521 = vpow2.f32 %v960_v40  ;;  %v898_v0 = vsub.f32 %v2124_v13, %v806_v58  ;;  %v899_v8 = vsub.f32 %v2126_v14, %v806_v58  ;;  %v2314_v13 = vpop.f32.mrb[10].mxu0  ;;  %v2494_v14 = vmov 1065369472  }
 0x314   : > { %v809_v54 = vpop.xlane.xlu1 %808  ;;  %1207 = vmatprep.mubr.bf16.mxu1 %v2494_v14  ;;  %v431_v60 = vpop.f32.mrb[11].mxu0 }
 0x315   : > { %v966_v9 = vmul.f32 1.442695, %v898_v0  ;;  %v900_v42 = vsub.f32 %v2128_v15, %v809_v54  ;;  %v901_v10 = vsub.f32 %v2132_v17, %v809_v54  ;;  %v968_v30 = vmul.f32 1.442695, %v899_v8 }
 0x316   : > { %v1118_v54 = vpack.c.bf16 %v2314_v13, %v2312_v52  ;;  %v1119_v8 = vpack.c.bf16 %v431_v60, %v427_v46 }
 0x317   : > { %v970_v12 = vmul.f32 1.442695, %v900_v42  ;;  %v972_v24 = vmul.f32 1.442695, %v901_v10  ;;  %1523 = vpow2.f32 %v966_v9 }
 0x318   : > { %1154 = vmatprep.mubr.bf16.mxu0 %v1119_v8 }
 0x319   : > { %1525 = vpow2.f32 %v970_v12  ;;  %v1516_v1 = vpop.eup %1515 }
 0x31a   : > { %1527 = vpow2.f32 %v972_v24  ;;  %v812_v40 = vpop.xlane.xlu0 %811 }
 0x31b   : > { %v1518_v7 = vpop.eup %1517  ;;  %1529 = vpow2.f32 %v968_v30  ;;  %v902_v15 = vsub.f32 %v2136_v19, %v812_v40  ;;  %v903_v17 = vsub.f32 %v2138_v20, %v812_v40  ;;  %v2323_v20 = vpop.f32.mrb[12].mxu0 }
 0x31c   : > { %v1520_v48 = vpop.eup %1519  ;;  %v815_v58 = vpop.xlane.xlu1 %814  ;;  %v1086_v0 = vpack.c.bf16 %v1518_v7, %v1516_v1 }
 0x31d   : > { %v1522_v9 = vpop.eup %1521  ;;  %v974_v42 = vmul.f32 1.442695, %v902_v15  ;;  %v904_v10 = vsub.f32 %v2140_v21, %v815_v58  ;;  %v905_v12 = vsub.f32 %v2144_v23, %v815_v58  ;;  %v976_v30 = vmul.f32 1.442695, %v903_v17  ;;  %v2325_v46 = vpop.f32.mrb[13].mxu0 }
 0x31e   : > { %v1087_v24 = vpack.c.bf16 %v1520_v48, %v1522_v9  ;;  %v2327_v40 = vpop.f32.mrb[14].mxu0 }
 0x31f   : > { %v978_v19 = vmul.f32 1.442695, %v904_v10  ;;  %v980_v14 = vmul.f32 1.442695, %v905_v12  ;;  %1531 = vpow2.f32 %v974_v42  ;;  %v1120_v17 = vpack.c.bf16 %v2327_v40, %v2323_v20  ;;  %v2333_v60 = vpop.f32.mrb[15].mxu0 }
 0x320   : > { %1122 = vmatprep.subr.bf16.mxu0 %v1087_v24  ;;  %1175 = vmatprep.subr.bf16.mxu1 %v1087_v24 }
 0x321   : > { %1533 = vpow2.f32 %v978_v19  ;;  %1123 = vmatpush1.bf16.xpose.msra.mxu0 %v1086_v0  ;;  %1176 = vmatpush1.bf16.xpose.msra.mxu1 %v1086_v0  ;;  %v1524_v1 = vpop.eup %1523 }
 0x322   : > { %1535 = vpow2.f32 %v980_v14  ;;  %v818_v21 = vpop.xlane.xlu0 %817  ;;  %v1121_v14 = vpack.c.bf16 %v2333_v60, %v2325_v46 }
 0x323   : > { %v1526_v23 = vpop.eup %1525  ;;  %1537 = vpow2.f32 %v976_v30  ;;  %v906_v7 = vsub.f32 %v2148_v25, %v818_v21  ;;  %v907_v15 = vsub.f32 %v2150_v26, %v818_v21 }
 0x324   : > { %v1528_v48 = vpop.eup %1527  ;;  %v821_v58 = vpop.xlane.xlu1 %820  ;;  %v1088_v0 = vpack.c.bf16 %v1526_v23, %v1524_v1 }
 0x325   : > { %v1530_v8 = vpop.eup %1529  ;;  %v982_v9 = vmul.f32 1.442695, %v906_v7  ;;  %v908_v42 = vsub.f32 %v2152_v27, %v821_v58  ;;  %v909_v10 = vsub.f32 %v2156_v29, %v821_v58  ;;  %v984_v12 = vmul.f32 1.442695, %v907_v15 }
 0x326   : > { %v1089_v25 = vpack.c.bf16 %v1528_v48, %v1530_v8 }
 0x327   : > { %v986_v26 = vmul.f32 1.442695, %v908_v42  ;;  %v988_v24 = vmul.f32 1.442695, %v909_v10  ;;  %1539 = vpow2.f32 %v982_v9 }
 0x328   : > { %1124 = vmatprep.subr.bf16.mxu0 %v1089_v25  ;;  %1177 = vmatprep.subr.bf16.mxu1 %v1089_v25 }
 0x329   : > { %1541 = vpow2.f32 %v986_v26  ;;  %1125 = vmatpush1.bf16.xpose.msra.mxu0 %v1088_v0  ;;  %1178 = vmatpush1.bf16.xpose.msra.mxu1 %v1088_v0  ;;  %v1532_v30 = vpop.eup %1531 }
 0x32a   : > { %1543 = vpow2.f32 %v988_v24  ;;  %v824_v19 = vpop.xlane.xlu0 %823 }
 0x32b   : > { %v1534_v1 = vpop.eup %1533  ;;  %1545 = vpow2.f32 %v984_v12  ;;  %v910_v21 = vsub.f32 %v2160_v31, %v824_v19  ;;  %v911_v27 = vsub.f32 %v2162_v32, %v824_v19 }
 0x32c   : > { %v1536_v29 = vpop.eup %1535  ;;  %v827_v23 = vpop.xlane.xlu1 %826  ;;  %v1090_v7 = vpack.c.bf16 %v1534_v1, %v1532_v30 }
 0x32d   : > { %v1538_v15 = vpop.eup %1537  ;;  %v990_v48 = vmul.f32 1.442695, %v910_v21  ;;  %v912_v58 = vsub.f32 %v2164_v33, %v827_v23  ;;  %v913_v8 = vsub.f32 %v2168_v35, %v827_v23  ;;  %v992_v0 = vmul.f32 1.442695, %v911_v27 }
 0x32e   : > { %v1091_v9 = vpack.c.bf16 %v1536_v29, %v1538_v15 }
 0x32f   : > { %v994_v42 = vmul.f32 1.442695, %v912_v58  ;;  %v996_v10 = vmul.f32 1.442695, %v913_v8  ;;  %1547 = vpow2.f32 %v990_v48 }
 0x330   : > { %1126 = vmatprep.subr.bf16.mxu0 %v1091_v9  ;;  %1179 = vmatprep.subr.bf16.mxu1 %v1091_v9 }
 0x331   : > { %1549 = vpow2.f32 %v994_v42  ;;  %1127 = vmatpush1.bf16.xpose.msra.mxu0 %v1090_v7  ;;  %1180 = vmatpush1.bf16.xpose.msra.mxu1 %v1090_v7  ;;  %v1540_v31 = vpop.eup %1539 }
 0x332   : > { %1551 = vpow2.f32 %v996_v10  ;;  %v830_v32 = vpop.xlane.xlu0 %829 }
 0x333   : > { %v1542_v25 = vpop.eup %1541  ;;  %1553 = vpow2.f32 %v992_v0  ;;  %v914_v12 = vsub.f32 %v2172_v37, %v830_v32  ;;  %v915_v33 = vsub.f32 %v2174_v38, %v830_v32 }
 0x334   : > { %v1544_v35 = vpop.eup %1543  ;;  %v833_v26 = vpop.xlane.xlu1 %832  ;;  %v1092_v24 = vpack.c.bf16 %v1542_v25, %v1540_v31 }
 0x335   : > { %v1546_v30 = vpop.eup %1545  ;;  %v998_v19 = vmul.f32 1.442695, %v914_v12  ;;  %v916_v1 = vsub.f32 %v2176_v39, %v833_v26  ;;  %v917_v21 = vsub.f32 %v2180_v41, %v833_v26  ;;  %v1000_v29 = vmul.f32 1.442695, %v915_v33 }
 0x336   : > { %v1093_v27 = vpack.c.bf16 %v1544_v35, %v1546_v30 }
 0x337   : > { %v1002_v23 = vmul.f32 1.442695, %v916_v1  ;;  %v1004_v7 = vmul.f32 1.442695, %v917_v21  ;;  %1555 = vpow2.f32 %v998_v19 }
 0x338   : > { %1128 = vmatprep.subr.bf16.mxu0 %v1093_v27  ;;  %1181 = vmatprep.subr.bf16.mxu1 %v1093_v27 }
 0x339   : > { %1557 = vpow2.f32 %v1002_v23  ;;  %1129 = vmatpush1.bf16.xpose.msra.mxu0 %v1092_v24  ;;  %1182 = vmatpush1.bf16.xpose.msra.mxu1 %v1092_v24  ;;  %v1548_v37 = vpop.eup %1547 }
 0x33a   : > { %1559 = vpow2.f32 %v1004_v7  ;;  %v836_v38 = vpop.xlane.xlu0 %835 }
 0x33b   : > { %v1550_v15 = vpop.eup %1549  ;;  %1561 = vpow2.f32 %v1000_v29  ;;  %v918_v48 = vsub.f32 %v2184_v43, %v836_v38  ;;  %v919_v39 = vsub.f32 %v2186_v44, %v836_v38 }
 0x33c   : > { %v1552_v41 = vpop.eup %1551  ;;  %v839_v58 = vpop.xlane.xlu1 %838  ;;  %v1094_v8 = vpack.c.bf16 %v1550_v15, %v1548_v37 }
 0x33d   : > { %v1554_v9 = vpop.eup %1553  ;;  %v1006_v0 = vmul.f32 1.442695, %v918_v48  ;;  %v920_v42 = vsub.f32 %v2188_v45, %v839_v58  ;;  %v921_v10 = vsub.f32 %v2192_v47, %v839_v58  ;;  %v1008_v32 = vmul.f32 1.442695, %v919_v39 }
 0x33e   : > { %v1095_v31 = vpack.c.bf16 %v1552_v41, %v1554_v9 }
 0x33f   : > { %v1010_v25 = vmul.f32 1.442695, %v920_v42  ;;  %v1012_v12 = vmul.f32 1.442695, %v921_v10  ;;  %1563 = vpow2.f32 %v1006_v0 }
 0x340   : > { %1130 = vmatprep.subr.bf16.mxu0 %v1095_v31  ;;  %1183 = vmatprep.subr.bf16.mxu1 %v1095_v31 }
 0x341   : > { %1565 = vpow2.f32 %v1010_v25  ;;  %1131 = vmatpush1.bf16.xpose.msra.mxu0 %v1094_v8  ;;  %1184 = vmatpush1.bf16.xpose.msra.mxu1 %v1094_v8  ;;  %v1556_v43 = vpop.eup %1555 }
 0x342   : > { %1567 = vpow2.f32 %v1012_v12  ;;  %v842_v44 = vpop.xlane.xlu0 %841 }
 0x343   : > { %v1558_v33 = vpop.eup %1557  ;;  %1569 = vpow2.f32 %v1008_v32  ;;  %v922_v35 = vsub.f32 %v2196_v49, %v842_v44  ;;  %v923_v45 = vsub.f32 %v2198_v50, %v842_v44 }
 0x344   : > { %v1560_v47 = vpop.eup %1559  ;;  %v845_v26 = vpop.xlane.xlu1 %844  ;;  %v1096_v24 = vpack.c.bf16 %v1558_v33, %v1556_v43 }
 0x345   : > { %v1562_v30 = vpop.eup %1561  ;;  %v1014_v19 = vmul.f32 1.442695, %v922_v35  ;;  %v924_v1 = vsub.f32 %v2200_v51, %v845_v26  ;;  %v925_v21 = vsub.f32 %v2204_v53, %v845_v26  ;;  %v1016_v29 = vmul.f32 1.442695, %v923_v45 }
 0x346   : > { %v1097_v27 = vpack.c.bf16 %v1560_v47, %v1562_v30 }
 0x347   : > { %v1018_v23 = vmul.f32 1.442695, %v924_v1  ;;  %v1020_v7 = vmul.f32 1.442695, %v925_v21  ;;  %1571 = vpow2.f32 %v1014_v19 }
 0x348   : > { %1132 = vmatprep.subr.bf16.mxu0 %v1097_v27  ;;  %1185 = vmatprep.subr.bf16.mxu1 %v1097_v27 }
 0x349   : > { %1573 = vpow2.f32 %v1018_v23  ;;  %1133 = vmatpush1.bf16.xpose.msra.mxu0 %v1096_v24  ;;  %1186 = vmatpush1.bf16.xpose.msra.mxu1 %v1096_v24  ;;  %v1564_v49 = vpop.eup %1563 }
 0x34a   : > { %1575 = vpow2.f32 %v1020_v7  ;;  %v848_v50 = vpop.xlane.xlu0 %847 }
 0x34b   : > { %v1566_v37 = vpop.eup %1565  ;;  %1577 = vpow2.f32 %v1016_v29  ;;  %v926_v38 = vsub.f32 %v2208_v55, %v848_v50  ;;  %v927_v51 = vsub.f32 %v2210_v56, %v848_v50 }
 0x34c   : > { %v1568_v53 = vpop.eup %1567  ;;  %v851_v15 = vpop.xlane.xlu1 %850  ;;  %v1098_v48 = vpack.c.bf16 %v1566_v37, %v1564_v49 }
 0x34d   : > { %v1570_v39 = vpop.eup %1569  ;;  %v1022_v41 = vmul.f32 1.442695, %v926_v38  ;;  %v928_v58 = vsub.f32 %v2212_v57, %v851_v15  ;;  %v929_v8 = vsub.f32 %v2216_v59, %v851_v15  ;;  %v1024_v0 = vmul.f32 1.442695, %v927_v51 }
 0x34e   : > { %v1099_v9 = vpack.c.bf16 %v1568_v53, %v1570_v39 }
 0x34f   : > { %v1026_v42 = vmul.f32 1.442695, %v928_v58  ;;  %v1028_v10 = vmul.f32 1.442695, %v929_v8  ;;  %1579 = vpow2.f32 %v1022_v41 }
 0x350   : > { %1134 = vmatprep.subr.bf16.mxu0 %v1099_v9  ;;  %1187 = vmatprep.subr.bf16.mxu1 %v1099_v9 }
 0x351   : > { %1581 = vpow2.f32 %v1026_v42  ;;  %1135 = vmatpush1.bf16.xpose.msra.mxu0 %v1098_v48  ;;  %1188 = vmatpush1.bf16.xpose.msra.mxu1 %v1098_v48  ;;  %v1572_v55 = vpop.eup %1571 }
 0x352   : > { %1583 = vpow2.f32 %v1028_v10  ;;  %v854_v56 = vpop.xlane.xlu0 %853 }
 0x353   : > { %v1574_v31 = vpop.eup %1573  ;;  %1585 = vpow2.f32 %v1024_v0  ;;  %v930_v32 = vsub.f32 %v2220_v61, %v854_v56  ;;  %v931_v57 = vsub.f32 %v2222_v62, %v854_v56 }
 0x354   : > { %v1576_v59 = vpop.eup %1575  ;;  %v857_v25 = vpop.xlane.xlu1 %856  ;;  %v1100_v12 = vpack.c.bf16 %v1574_v31, %v1572_v55 }
 0x355   : > { %v1578_v43 = vpop.eup %1577  ;;  %v1030_v44 = vmul.f32 1.442695, %v930_v32  ;;  %v932_v33 = vsub.f32 %v2224_v63, %v857_v25  ;;  %v933_v35 = vsub.f32 %v2228_v2, %v857_v25  ;;  %v1032_v47 = vmul.f32 1.442695, %v931_v57  ;;  %v2517_v25 = vld [vmem:[#allocation12_spill] sm:$0xff] }
 0x356   : > { %v1101_v45 = vpack.c.bf16 %v1576_v59, %v1578_v43  ;;  %v2518_v43 = vld [vmem:[#allocation13_spill] sm:$0xff] }
 0x357   : > { %v1034_v26 = vmul.f32 1.442695, %v932_v33  ;;  %v1036_v24 = vmul.f32 1.442695, %v933_v35  ;;  %1587 = vpow2.f32 %v1030_v44 }
 0x358   : > { %1136 = vmatprep.subr.bf16.mxu0 %v1101_v45  ;;  %1189 = vmatprep.subr.bf16.mxu1 %v1101_v45 }
 0x359   : > { %1589 = vpow2.f32 %v1034_v26  ;;  %1137 = vmatpush1.bf16.xpose.msra.mxu0 %v1100_v12  ;;  %1190 = vmatpush1.bf16.xpose.msra.mxu1 %v1100_v12  ;;  %v1580_v61 = vpop.eup %1579 }
 0x35a   : > { %1591 = vpow2.f32 %v1036_v24  ;;  %v860_v62 = vpop.xlane.xlu0 %859  ;;  %v2519_v24 = vld [vmem:[#allocation14_spill] sm:$0xff] }
 0x35b   : > { %v1582_v30 = vpop.eup %1581  ;;  %1593 = vpow2.f32 %v1032_v47  ;;  %v934_v19 = vsub.f32 %v2232_v4, %v860_v62  ;;  %v935_v63 = vsub.f32 %v2234_v5, %v860_v62  ;;  %v2520_v62 = vld [vmem:[#allocation15_spill] sm:$0xff] }
 0x35c   : > { %v1584_v2 = vpop.eup %1583  ;;  %v863_v1 = vpop.xlane.xlu1 %862  ;;  %v1102_v21 = vpack.c.bf16 %v1582_v30, %v1580_v61 }
 0x35d   : > { %v1586_v27 = vpop.eup %1585  ;;  %v1038_v29 = vmul.f32 1.442695, %v934_v19  ;;  %v936_v23 = vsub.f32 %v2236_v6, %v863_v1  ;;  %v937_v7 = vsub.f32 %v2240_v11, %v863_v1  ;;  %v1040_v50 = vmul.f32 1.442695, %v935_v63 }
 0x35e   : > { %v1103_v49 = vpack.c.bf16 %v1584_v2, %v1586_v27  ;;  %v2521_v27 = vld [vmem:[#allocation16_spill] sm:$0xff] }
 0x35f   : > { %v1042_v37 = vmul.f32 1.442695, %v936_v23  ;;  %v1044_v38 = vmul.f32 1.442695, %v937_v7  ;;  %1595 = vpow2.f32 %v1038_v29  ;;  %v2522_v23 = vld [vmem:[#allocation17_spill] sm:$0xff] }
 0x360   : > { %1138 = vmatprep.subr.bf16.mxu0 %v1103_v49  ;;  %1191 = vmatprep.subr.bf16.mxu1 %v1103_v49 }
 0x361   : > { %1597 = vpow2.f32 %v1042_v37  ;;  %1139 = vmatpush1.bf16.xpose.msra.mxu0 %v1102_v21  ;;  %1192 = vmatpush1.bf16.xpose.msra.mxu1 %v1102_v21  ;;  %v1588_v4 = vpop.eup %1587 }
 0x362   : > { %1599 = vpow2.f32 %v1044_v38  ;;  %v866_v5 = vpop.xlane.xlu0 %865 }
 0x363   : > { %v1590_v51 = vpop.eup %1589  ;;  %1601 = vpow2.f32 %v1040_v50  ;;  %v938_v53 = vsub.f32 %v2244_v16, %v866_v5  ;;  %v939_v6 = vsub.f32 %v2246_v18, %v866_v5 }
 0x364   : > { %v1592_v11 = vpop.eup %1591  ;;  %v869_v15 = vpop.xlane.xlu1 %868  ;;  %v1104_v48 = vpack.c.bf16 %v1590_v51, %v1588_v4 }
 0x365   : > { %v1594_v39 = vpop.eup %1593  ;;  %v1046_v41 = vmul.f32 1.442695, %v938_v53  ;;  %v940_v58 = vsub.f32 %v2248_v22, %v869_v15  ;;  %v941_v8 = vsub.f32 %v2252_v28, %v869_v15  ;;  %v1048_v0 = vmul.f32 1.442695, %v939_v6  ;;  %v2523_v53 = vld [vmem:[#allocation18_spill] sm:$0xff] }
 0x366   : > { %v1105_v9 = vpack.c.bf16 %v1592_v11, %v1594_v39  ;;  %v2524_v11 = vld [vmem:[#allocation19_spill] sm:$0xff] }
 0x367   : > { %v1050_v42 = vmul.f32 1.442695, %v940_v58  ;;  %v1052_v10 = vmul.f32 1.442695, %v941_v8  ;;  %1603 = vpow2.f32 %v1046_v41 }
 0x368   : > { %1140 = vmatprep.subr.bf16.mxu0 %v1105_v9  ;;  %1193 = vmatprep.subr.bf16.mxu1 %v1105_v9 }
 0x369   : > { %1605 = vpow2.f32 %v1050_v42  ;;  %1141 = vmatpush1.bf16.xpose.msra.mxu0 %v1104_v48  ;;  %1194 = vmatpush1.bf16.xpose.msra.mxu1 %v1104_v48  ;;  %v1596_v16 = vpop.eup %1595 }
 0x36a   : > { %1607 = vpow2.f32 %v1052_v10  ;;  %v872_v18 = vpop.xlane.xlu0 %871  ;;  %v2526_v10 = vld [vmem:[#allocation21_spill] sm:$0xff] }
 0x36b   : > { %v1598_v55 = vpop.eup %1597  ;;  %1609 = vpow2.f32 %v1048_v0  ;;  %v942_v56 = vsub.f32 %v2256_v34, %v872_v18  ;;  %v943_v22 = vsub.f32 %v2258_v36, %v872_v18  ;;  %v2525_v0 = vld [vmem:[#allocation20_spill] sm:$0xff] }
 0x36c   : > { %v1600_v28 = vpop.eup %1599  ;;  %v875_v31 = vpop.xlane.xlu1 %874  ;;  %v1106_v32 = vpack.c.bf16 %v1598_v55, %v1596_v16 }
 0x36d   : > { %v1602_v57 = vpop.eup %1601  ;;  %v1054_v59 = vmul.f32 1.442695, %v942_v56  ;;  %v944_v12 = vsub.f32 %v2517_v25, %v875_v31  ;;  %v945_v44 = vsub.f32 %v2518_v43, %v875_v31  ;;  %v1056_v35 = vmul.f32 1.442695, %v943_v22 }
 0x36e   : > { %v1107_v33 = vpack.c.bf16 %v1600_v28, %v1602_v57 }
 0x36f   : > { %v1058_v45 = vmul.f32 1.442695, %v944_v12  ;;  %v1060_v47 = vmul.f32 1.442695, %v945_v44  ;;  %1611 = vpow2.f32 %v1054_v59  ;;  %v2528_v59 = vld [vmem:[#allocation23_spill] sm:$0xff] }
 0x370   : > { %1142 = vmatprep.subr.bf16.mxu0 %v1107_v33  ;;  %1195 = vmatprep.subr.bf16.mxu1 %v1107_v33 }
 0x371   : > { %1613 = vpow2.f32 %v1058_v45  ;;  %1143 = vmatpush1.bf16.xpose.msra.mxu0 %v1106_v32  ;;  %1196 = vmatpush1.bf16.xpose.msra.mxu1 %v1106_v32  ;;  %v1604_v34 = vpop.eup %1603  ;;  %v2527_v32 = vld [vmem:[#allocation22_spill] sm:$0xff] }
 0x372   : > { %1615 = vpow2.f32 %v1060_v47  ;;  %v878_v36 = vpop.xlane.xlu0 %877 }
 0x373   : > { %v1606_v26 = vpop.eup %1605  ;;  %1617 = vpow2.f32 %v1056_v35  ;;  %v946_v61 = vsub.f32 %v2519_v24, %v878_v36  ;;  %v947_v30 = vsub.f32 %v2520_v62, %v878_v36 }
 0x374   : > { %v1608_v19 = vpop.eup %1607  ;;  %v881_v63 = vpop.xlane.xlu1 %880  ;;  %v1108_v2 = vpack.c.bf16 %v1606_v26, %v1604_v34  ;;  %v2529_v34 = vld [vmem:[#allocation24_spill] sm:$0xff] }
 0x375   : > { %v1610_v1 = vpop.eup %1609  ;;  %v1062_v21 = vmul.f32 1.442695, %v946_v61  ;;  %v948_v29 = vsub.f32 %v2521_v27, %v881_v63  ;;  %v949_v7 = vsub.f32 %v2522_v23, %v881_v63  ;;  %v1064_v50 = vmul.f32 1.442695, %v947_v30 }
 0x376   : > { %v1109_v49 = vpack.c.bf16 %v1608_v19, %v1610_v1 }
 0x377   : > { %v1066_v37 = vmul.f32 1.442695, %v948_v29  ;;  %v1068_v38 = vmul.f32 1.442695, %v949_v7  ;;  %1619 = vpow2.f32 %v1062_v21 }
 0x378   : > { %1144 = vmatprep.subr.bf16.mxu0 %v1109_v49  ;;  %1197 = vmatprep.subr.bf16.mxu1 %v1109_v49  ;;  %v2530_v49 = vmov 1065369472  }
 0x379   : > { %1621 = vpow2.f32 %v1066_v37  ;;  %1145 = vmatpush1.bf16.xpose.msra.mxu0 %v1108_v2  ;;  %1198 = vmatpush1.bf16.xpose.msra.mxu1 %v1108_v2  ;;  %v1612_v4 = vpop.eup %1611 }
 0x37a   : > { %1623 = vpow2.f32 %v1068_v38  ;;  %v884_v5 = vpop.xlane.xlu0 %883  ;;  %v1218_v38 = vlaneseq }
 0x37b   : > { %v1614_v51 = vpop.eup %1613  ;;  %1625 = vpow2.f32 %v1064_v50  ;;  %v950_v6 = vsub.f32 %v2523_v53, %v884_v5  ;;  %v951_v15 = vsub.f32 %v2524_v11, %v884_v5 }
 0x37c   : > { %v1616_v48 = vpop.eup %1615  ;;  %v887_v39 = vpop.xlane.xlu1 %886  ;;  %v1110_v41 = vpack.c.bf16 %v1614_v51, %v1612_v4  ;;  %v1219_v53 = vshrl.u32 %v1218_v38, 7 }
 0x37d   : > { %v1618_v58 = vpop.eup %1617  ;;  %v1070_v8 = vmul.f32 1.442695, %v950_v6  ;;  %v1072_v9 = vmul.f32 1.442695, %v951_v15  ;;  %v952_v42 = vsub.f32 %v2525_v0, %v887_v39  ;;  %v953_v16 = vsub.f32 %v2526_v10, %v887_v39 }
 0x37e   : > { %v1111_v18 = vpack.c.bf16 %v1616_v48, %v1618_v58  ;;  %v1220_v6 = vsub.s32 0, %v1219_v53  ;;  %v1235_v15 = vstv %s1234_s10 }
 0x37f   : > { %1627 = vpow2.f32 %v1070_v8  ;;  %v1074_v55 = vmul.f32 1.442695, %v952_v42  ;;  %v1076_v56 = vmul.f32 1.442695, %v953_v16 }
 0x380   : > { %1629 = vpow2.f32 %v1072_v9  ;;  %1146 = vmatprep.subr.bf16.mxu0 %v1111_v18  ;;  %1199 = vmatprep.subr.bf16.mxu1 %v1111_v18 }
 0x381   : > { %1631 = vpow2.f32 %v1074_v55  ;;  %1147 = vmatpush1.bf16.xpose.msra.mxu0 %v1110_v41  ;;  %1200 = vmatpush1.bf16.xpose.msra.mxu1 %v1110_v41  ;;  %v1620_v22 = vpop.eup %1619 }
 0x382   : > { %1633 = vpow2.f32 %v1076_v56  ;;  %v890_v28 = vpop.xlane.xlu0 %889 }
 0x383   : > { %v1622_v31 = vpop.eup %1621  ;;  %v954_v57 = vsub.f32 %v2527_v32, %v890_v28  ;;  %v955_v25 = vsub.f32 %v2528_v59, %v890_v28 }
 0x384   : > { %v1624_v12 = vpop.eup %1623  ;;  %v893_v43 = vpop.xlane.xlu1 %892  ;;  %v1112_v44 = vpack.c.bf16 %v1622_v31, %v1620_v22 }
 0x385   : > { %v1626_v33 = vpop.eup %1625  ;;  %v1078_v35 = vmul.f32 1.442695, %v954_v57  ;;  %v1080_v45 = vmul.f32 1.442695, %v955_v25  ;;  %v956_v47 = vsub.f32 %v2296_v3, %v893_v43  ;;  %v957_v36 = vsub.f32 %v2529_v34, %v893_v43  ;;  %v1647_v57 = vld [vmem:[%s2028_s29] sm:$0xff]  ;;  %v1648_v25 = vld [vmem:[%s2028_s29 + $0x10] sm:$0xff] }
 0x386   : > { %v1113_v26 = vpack.c.bf16 %v1624_v12, %v1626_v33  ;;  %v1649_v43 = vld [vmem:[%s2028_s29 + $0x20] sm:$0xff]  ;;  %v1650_v33 = vld [vmem:[%s2028_s29 + $0x30] sm:$0xff]  ;;  %v1652_v34 = vld [vmem:[%s2028_s29 + $0x18] sm:$0xff] }
 0x387   : > { %1635 = vpow2.f32 %v1078_v35  ;;  %v1082_v24 = vmul.f32 1.442695, %v956_v47  ;;  %v1084_v61 = vmul.f32 1.442695, %v957_v36 }
 0x388   : > { %1637 = vpow2.f32 %v1080_v45  ;;  %1148 = vmatprep.subr.bf16.mxu0 %v1113_v26  ;;  %1201 = vmatprep.subr.bf16.mxu1 %v1113_v26  ;;  %v1651_v45 = vld [vmem:[%s2028_s29 + $0x8] sm:$0xff] }
 0x389   : > { %v1628_v62 = vpop.eup %1627  ;;  %1639 = vpow2.f32 %v1082_v24  ;;  %1149 = vmatpush1.bf16.xpose.msra.mxu0 %v1112_v44  ;;  %1202 = vmatpush1.bf16.xpose.msra.mxu1 %v1112_v44  ;;  %v1653_v26 = vld [vmem:[%s2028_s29 + $0x28] sm:$0xff] }
 0x38a   : > { %v1630_v30 = vpop.eup %1629  ;;  %1641 = vpow2.f32 %v1084_v61  ;;  %v1654_v61 = vld [vmem:[%s2028_s29 + $0x38] sm:$0xff]  ;;  %s1721_s29 = scalar_lea.vmem %s1720_s12, 2048 }
 0x38b   : > { %v1632_v19 = vpop.eup %1631  ;;  %p1723_p10 = scmp.lt.s32.totalorder %s1721_s29, %s1715_s11 }
 0x38c   : > { %v1634_v63 = vpop.eup %1633  ;;  %v1114_v2 = vpack.c.bf16 %v1632_v19, %v1628_v62 }
 0x38d   : > { %v1115_v1 = vpack.c.bf16 %v1634_v63, %v1630_v30  ;;  %p1724_p9 = por %p1723_p10, %p1722_p7 }
 0x38f   : > { %1150 = vmatprep.subr.bf16.mxu0 %v1115_v1  ;;  %1203 = vmatprep.subr.bf16.mxu1 %v1115_v1  ;;  %p1725_p11 = pnand %p1724_p9, %p1718_p13 }
 0x391   : > { %v1636_v3 = vpop.eup %1635  ;;  %1151 = vmatpush1.bf16.xpose.msra.mxu0 %v1114_v2  ;;  %1204 = vmatpush1.bf16.xpose.msra.mxu1 %v1114_v2 }
 0x392   : > { %v1638_v21 = vpop.eup %1637 }
 0x393   : > { %v1640_v27 = vpop.eup %1639 }
 0x394   : > { %v1642_v29 = vpop.eup %1641  ;;  %v1116_v23 = vpack.c.bf16 %v1640_v27, %v1636_v3 }
 0x395   : > { %v1117_v7 = vpack.c.bf16 %v1642_v29, %v1638_v21 }
 0x397   : > { %1152 = vmatprep.subr.bf16.mxu0 %v1117_v7  ;;  %1205 = vmatprep.subr.bf16.mxu1 %v1117_v7 }
 0x399   : > { %1153 = vmatpush1.bf16.xpose.msra.mxu0 %v1116_v23  ;;  %1206 = vmatpush1.bf16.xpose.msra.mxu1 %v1116_v23 }
 0x3a0   : > { %1155 = vmatmul.mubr.bf16.vlgmr.msra.gmra.mrb[16].mxu0 %v1118_v54  ;;  %1208 = vmatmul.mubr.bf16.vlgmr.msra.gmra.mrb[72].mxu1 %v2530_v49 }
 0x3a1   : > { %1164 = vmatprep.mubr.bf16.mxu0 %v1121_v14 }
 0x3a8   : > { %1165 = vmatmul.mubr.bf16.gmra.mrb[20].mxu0 %v1120_v17 }
 0x473   : > { %v1156_v50 = vpop.f32.mrb[16].mxu0  ;;  %v1209_v37 = vpop.f32.mrb[72].mxu1 }
 0x474   : > { %1643 = vrcp.f32 %v1209_v37  ;;  %v1158_v4 = vpop.f32.mrb[17].mxu0  ;;  %v1211_v5 = vpop.f32.mrb[73].mxu1 }
 0x475   : > { %1645 = vrcp.f32 %v1211_v5  ;;  %v1160_v51 = vpop.f32.mrb[18].mxu0  ;;  %v1213_v52 = vpop.f32.mrb[74].mxu1 }
 0x476   : > { %v1162_v13 = vpop.f32.mrb[19].mxu0  ;;  %v1214_v54 = vpop.f32.mrb[75].mxu1 }
 0x47b   : > { %v1166_v46 = vpop.f32.mrb[20].mxu0 }
 0x47c   : > { %v1168_v60 = vpop.f32.mrb[21].mxu0 }
 0x47d   : > { %v1170_v14 = vpop.f32.mrb[22].mxu0 }
 0x47e   : > { %v1644_v20 = vpop.eup %1643  ;;  %v1172_v40 = vpop.f32.mrb[23].mxu0 }
 0x47f   : > { %v1646_v17 = vpop.eup %1645  ;;  %v1221_v11 = vrot.slane %v1644_v20, %v1220_v6 }
 0x480   : > { %v1225_v48 = vrot.slane %v1646_v17, %v1220_v6 }
 0x481   : > { %v1226_v39 = vmul.f32 %v1221_v11, %v1156_v50  ;;  %v1228_v41 = vmul.f32 %v1221_v11, %v1160_v51  ;;  %v1230_v58 = vmul.f32 %v1221_v11, %v1166_v46  ;;  %v1232_v8 = vmul.f32 %v1221_v11, %v1170_v14 }
 0x482   : > { %v1227_v9 = vmul.f32 %v1225_v48, %v1158_v4  ;;  %v1229_v0 = vmul.f32 %v1225_v48, %v1162_v13  ;;  %v1231_v42 = vmul.f32 %v1225_v48, %v1168_v60  ;;  %v1233_v10 = vmul.f32 %v1225_v48, %v1172_v40 }
 0x483   : > { %v1236_v16 = vmul.f32 %v1235_v15, %v1226_v39  ;;  %v1238_v18 = vmul.f32 %v1235_v15, %v1228_v41  ;;  %v1240_v55 = vmul.f32 %v1235_v15, %v1230_v58  ;;  %v1242_v56 = vmul.f32 %v1235_v15, %v1232_v8 }
 0x484   : > { %v1237_v22 = vmul.f32 %v1235_v15, %v1227_v9  ;;  %v1239_v28 = vmul.f32 %v1235_v15, %v1229_v0  ;;  %v1241_v31 = vmul.f32 %v1235_v15, %v1231_v42  ;;  %v1243_v32 = vmul.f32 %v1235_v15, %v1233_v10 }
 0x485   : > { %v1244_v59 = vadd.f32 %v1647_v57, %v1236_v16  ;;  %v1246_v12 = vadd.f32 %v1648_v25, %v1238_v18  ;;  %v1248_v44 = vadd.f32 %v1649_v43, %v1240_v55  ;;  %v1250_v35 = vadd.f32 %v1650_v33, %v1242_v56 }
 0x486   : > { %v1245_v47 = vadd.f32 %v1651_v45, %v1237_v22  ;;  %v1247_v36 = vadd.f32 %v1652_v34, %v1239_v28  ;;  %v1249_v24 = vadd.f32 %v1653_v26, %v1241_v31  ;;  %v1251_v62 = vadd.f32 %v1654_v61, %v1243_v32 }
 0x487   : > { %1252 = vst [vmem:[%s2399_s14] sm:$0xff] %v1244_v59  ;;  %1254 = vst [vmem:[%s2399_s14 + $0x10] sm:$0xff] %v1246_v12 }
 0x488   : > { %1256 = vst [vmem:[%s2399_s14 + $0x20] sm:$0xff] %v1248_v44  ;;  %1258 = vst [vmem:[%s2399_s14 + $0x30] sm:$0xff] %v1250_v35 }
 0x489   : > { %1253 = vst [vmem:[%s2399_s14 + $0x8] sm:$0xff] %v1245_v47  ;;  %1255 = vst [vmem:[%s2399_s14 + $0x18] sm:$0xff] %v1247_v36 }
 0x48a   : > { %1257 = vst [vmem:[%s2399_s14 + $0x28] sm:$0xff] %v1249_v24  ;;  %1259 = vst [vmem:[%s2399_s14 + $0x38] sm:$0xff] %v1251_v62 }
 0x48b   : > { %1728 = shalt.err (!%p1725_p11)
}
 0x48c   : > { %s1729_s4 = scalar_lea.hbm %s2409_s28, 1024  ;;  %s1733_s13 = scalar_lea.hbm %s2477_s5, 2048 }
 0x48d   : > { %p1730_p1 = scmp.ne.s32.totalorder %s2409_s28, %s1729_s4  ;;  %p1734_p5 = scmp.lt.u32.totalorder %s2409_s28, %s2477_s5 }
 0x48e   : > { %p1735_p4 = scmp.lt.u32.totalorder %s1733_s13, %s1729_s4  ;;  %p1737_p0 = scmp.lt.u32.totalorder %s1729_s4, %s2409_s28 }
 0x48f   : > { %p1731_p6 = pnand %p1730_p1, %p2531_p3 }
 0x490   : > { %p1736_p8 = por %p1735_p4, %p1734_p5 }
 0x491   : > { %p1732_p2 = pneg %p1731_p6 }
 0x492   : > { %p1738_p12 = por %p1737_p0, %p1736_p8 }
 0x494   : > { %p1739_p13 = pnand %p1738_p12, %p1732_p2 }
 0x496   : > { %1742 = shalt.err (!%p1739_p13)
}
 0x497   : > { %s1810_s14 = smov 256   ;;  %s1811_s23 = smov 16  }
 0x498   : > { %1440 = dma.vmem_to_hbm [thread:$0]  (%p2531_p3), %s2411_s16, 1024, %s2409_s28, %s1261_s15, %s1810_s14, %s1810_s14, %s1811_s23  }
 0x499 PF: > { %s1291_s30 = sand.u32 1, %s1781_s20   ;;  %p2532_p7 = scmp.ne.s32.totalorder %s2498_s9, 0 }
 0x49a   : > { %p2533_p10 = scmp.ge.s32.totalorder %s1801_s25, 2  ;;  %s1292_s11 = scalar_lea.sflag [#allocation5], %s1291_s30 }
 0x49c   : > { %p1450_p9 = pnand %p2533_p10, %p2532_p7 }
 0x49e   : > { %1776 = dma.done.wait (!%p1450_p9), %s1292_s11, 1024  }
 0x49f   : > { %1778 = vsyncadd (!%p1450_p9), %s1292_s11, 4294966272  ;;  %s25_s25 = sadd.s32 1, %s1801_s25   ;;  %s2534_s20 = smov %s1785_s21 }
 0x4a0   : > { %p22_p11 = scmp.ge.s32.totalorder %s25_s25, 4   ;;  %s2535_s21 = smov %s1789_s22 }
 0x4a1   : > { %s2536_s22 = smov %s1901_s8  ;;  %s2537_s23 = smov %s1797_s24 }
 0x4a2   : > { %s2538_s24 = smov %s2540_s27  ;;  %24 = sbr.rel (!%p22_p11) target bundleno = 10 (0xa), region = 98 }
 0x4a9   :  { %1297 = vsyncpa [#allocation4], 1 }
 0x4aa   :  { %1299 = vsyncpa [#allocation4 + $0x1], 1 }
 0x4ab   :  { %1300 = vsyncpa [#allocation7], 1 }
 0x4ac   :  { %1302 = vsyncpa [#allocation7 + $0x1], 1 }
 0x4ad   :  { %1303 = vsyncpa [#allocation5], 1 }
 0x4ae   :  { %1305 = vsyncpa [#allocation5 + $0x1], 1 }

</bundles_post_ra>
